<compile_context>
chip_gen: v5e
topology: v5e:2x2
jax: 0.10.0
libtpu: 0.0.40
codegen_flags: <defaults>
</compile_context>

<pallas_src>
import jax
import jax.numpy as jnp
from jax.experimental import pallas as pl
from jax.experimental.pallas import tpu as pltpu


def _lora_kernel(x_ref, wt_ref, bias_ref, bt_ref, at_ref, o_ref,
                 acc_ref, xb_ref):
    n = pl.program_id(1)
    k = pl.program_id(2)
    nk = pl.num_programs(2)

    @pl.when(k == 0)
    def _():
        acc_ref[...] = jnp.zeros_like(acc_ref)

    @pl.when(jnp.logical_and(n == 0, k == 0))
    def _():
        xb_ref[...] = jnp.zeros_like(xb_ref)

    x = x_ref[...]  # (tm, tk) bf16

    # Frozen base layer partial product: (tm, tk) @ (tk, tn), f32 accumulate.
    acc_ref[...] += jnp.dot(x, wt_ref[...], preferred_element_type=jnp.float32)

    # LoRA down-projection xb = x @ B.T: computed only on the first N tile of
    # each M tile and reused across all remaining N tiles of that M tile.
    @pl.when(n == 0)
    def _():
        xb_ref[...] += jnp.dot(x, bt_ref[...],
                               preferred_element_type=jnp.float32)

    # K-epilogue: bias + LoRA up-projection (alpha/r already folded into A).
    @pl.when(k == nk - 1)
    def _():
        delta = jnp.dot(xb_ref[...].astype(at_ref.dtype), at_ref[...],
                        preferred_element_type=jnp.float32)
        o_ref[...] = (acc_ref[...] + bias_ref[...] + delta).astype(o_ref.dtype)


def _pick_tile(dim, pref, align):
    """Largest tile <= pref that divides dim and is a multiple of align,
    falling back to the full dimension."""
    if dim <= pref:
        return dim
    for t in range(pref, 0, -align):
        if dim % t == 0:
            return t
    return dim


def lora_forward(x, W, bias, A, B, *, alpha, r,
                 compute_dtype=jnp.bfloat16, bm=256, bn=512, bk=512):
    """x: (batch, in). W: (out, in). bias: (out,). A: (out, r). B: (r, in)."""
    M, K = x.shape
    N, K2 = W.shape
    assert K == K2 and A.shape == (N, r) and B.shape == (r, K)
    scale = float(alpha) / float(r)

    # One-time layout / dtype prep outside the kernel: pre-transpose so the
    # MXU consumes stored layout, fold alpha/r into A (scale applied in f32
    # before the bf16 cast), cast matmul operands to bf16.
    wt = W.T.astype(compute_dtype)                                  # (K, N)
    bt = B.T.astype(compute_dtype)                                  # (K, r)
    at = (A.astype(jnp.float32) * scale).T.astype(compute_dtype)    # (r, N)
    xc = x.astype(compute_dtype)                                    # (M, K)
    bias2d = bias.reshape(1, N).astype(jnp.float32)                 # (1, N)

    tm = _pick_tile(M, bm, 8)
    tn = _pick_tile(N, bn, 128)
    tk = _pick_tile(K, bk, 128)
    grid = (M // tm, N // tn, K // tk)

    return pl.pallas_call(
        _lora_kernel,
        out_shape=jax.ShapeDtypeStruct((M, N), jnp.float32),
        grid_spec=pltpu.PrefetchScalarGridSpec(
            num_scalar_prefetch=0,
            grid=grid,
            in_specs=[
                pl.BlockSpec((tm, tk), lambda m, n, k: (m, k)),   # x
                pl.BlockSpec((tk, tn), lambda m, n, k: (k, n)),   # W.T
                pl.BlockSpec((1, tn), lambda m, n, k: (0, n)),    # bias
                pl.BlockSpec((tk, r), lambda m, n, k: (k, 0)),    # B.T
                pl.BlockSpec((r, tn), lambda m, n, k: (0, n)),    # (alpha/r*A).T
            ],
            out_specs=pl.BlockSpec((tm, tn), lambda m, n, k: (m, n)),
            scratch_shapes=[
                pltpu.VMEM((tm, tn), jnp.float32),   # base-path f32 accumulator
                pltpu.VMEM((tm, r), jnp.float32),    # xb = x @ B.T (per M tile)
            ],
        ),
        compiler_params=pltpu.CompilerParams(
            # M tiles are independent -> shardable across TensorCores (v7x).
            # N must stay arbitrary (xb scratch written at n==0, read at n>0).
            dimension_semantics=("parallel", "arbitrary", "arbitrary"),
        ),
    )(xc, wt, bias2d, bt, at)


if __name__ == "__main__":
    # Deterministic synthetic parameters (no checkpoint loading).
    key = jax.random.PRNGKey(0)
    k_x, k_w, k_b, k_a, k_bm = jax.random.split(key, 5)

    batch, in_features, out_features, r, alpha = 16, 1024, 1024, 4, 16.0

    x = jax.random.normal(k_x, (batch, in_features), dtype=jnp.float32)
    W = jax.random.normal(k_w, (out_features, in_features), dtype=jnp.float32) * 0.05
    bias = jax.random.normal(k_b, (out_features,), dtype=jnp.float32) * 0.05
    A = jax.random.normal(k_a, (out_features, r), dtype=jnp.float32) * 0.01
    B = jax.random.normal(k_bm, (r, in_features), dtype=jnp.float32) * 0.01

    out = lora_forward(x, W, bias, A, B, alpha=alpha, r=r)
    out = jax.block_until_ready(out)

    # Reference mirrors the PyTorch forward exactly, using the same
    # bf16-rounded operands the kernel feeds to the MXU (f32 accumulation).
    bf = lambda a: a.astype(jnp.bfloat16).astype(jnp.float32)
    scale = alpha / r
    ref = bf(x) @ bf(W).T + bias + bf(x) @ bf(B).T @ bf(A * scale).T

    assert out.shape == (batch, out_features)
    assert jnp.allclose(out, ref, atol=5e-3, rtol=5e-3)

    print("KERNEL_OK")
</pallas_src>

<mosaic_0001>
module attributes {stable_mosaic.version = 11 : i64} {
  func.func @_lora_kernel(%arg0: i32, %arg1: i32, %arg2: i32, %arg3: memref<16x512xbf16, #tpu.memory_space<vmem>>, %arg4: memref<512x512xbf16, #tpu.memory_space<vmem>>, %arg5: memref<1x512xf32, #tpu.memory_space<vmem>>, %arg6: memref<512x4xbf16, #tpu.memory_space<vmem>>, %arg7: memref<4x512xbf16, #tpu.memory_space<vmem>>, %arg8: memref<16x512xf32, #tpu.memory_space<vmem>>, %arg9: memref<16x512xf32, #tpu.memory_space<vmem>>, %arg10: memref<16x4xf32, #tpu.memory_space<vmem>>) attributes {dimension_semantics = [#tpu.dimension_semantics<parallel>, #tpu.dimension_semantics<arbitrary>, #tpu.dimension_semantics<arbitrary>], iteration_bounds = array<i64: 1, 2, 2>, scalar_prefetch = 0 : i64, scratch_operands = 2 : i64, tpu.core_type = #tpu.core_type<tc>, window_params = [{transform_indices = @transform_0, window_bounds = array<i64: 16, 512>}, {transform_indices = @transform_1, window_bounds = array<i64: 512, 512>}, {transform_indices = @transform_2, window_bounds = array<i64: 1, 512>}, {transform_indices = @transform_3, window_bounds = array<i64: 512, 4>}, {transform_indices = @transform_4, window_bounds = array<i64: 4, 512>}, {transform_indices = @transform_5, window_bounds = array<i64: 16, 512>}]} {
    %c0_i32 = arith.constant 0 : i32
    %0 = arith.cmpi eq, %arg2, %c0_i32 : i32
    %1 = arith.extui %0 : i1 to i32
    %c0_i32_0 = arith.constant 0 : i32
    %2 = arith.cmpi ne, %1, %c0_i32_0 : i32
    scf.if %2 {
      %cst_14 = arith.constant 0.000000e+00 : f32
      %20 = vector.broadcast %cst_14 : f32 to vector<16x512xf32>
      %c0_15 = arith.constant 0 : index
      %c0_16 = arith.constant 0 : index
      %21 = vector.load %arg9[%c0_15, %c0_16] : memref<16x512xf32, #tpu.memory_space<vmem>>, vector<16x512xf32>
      tpu.vector_store %arg9[%c0_15, %c0_16], %20 {strides = array<i32>} : memref<16x512xf32, #tpu.memory_space<vmem>>, vector<16x512xf32>,
    } else {
    }
    %c0_i32_1 = arith.constant 0 : i32
    %3 = arith.cmpi eq, %arg1, %c0_i32_1 : i32
    %c0_i32_2 = arith.constant 0 : i32
    %4 = arith.cmpi eq, %arg2, %c0_i32_2 : i32
    %5 = arith.andi %3, %4 : i1
    %6 = arith.extui %5 : i1 to i32
    %c0_i32_3 = arith.constant 0 : i32
    %7 = arith.cmpi ne, %6, %c0_i32_3 : i32
    scf.if %7 {
      %cst_14 = arith.constant 0.000000e+00 : f32
      %20 = vector.broadcast %cst_14 : f32 to vector<16x4xf32>
      %c0_15 = arith.constant 0 : index
      %c0_16 = arith.constant 0 : index
      %21 = vector.load %arg10[%c0_15, %c0_16] : memref<16x4xf32, #tpu.memory_space<vmem>>, vector<16x4xf32>
      tpu.vector_store %arg10[%c0_15, %c0_16], %20 {strides = array<i32>} : memref<16x4xf32, #tpu.memory_space<vmem>>, vector<16x4xf32>,
    } else {
    }
    %c0 = arith.constant 0 : index
    %c0_4 = arith.constant 0 : index
    %8 = vector.load %arg3[%c0, %c0_4] : memref<16x512xbf16, #tpu.memory_space<vmem>>, vector<16x512xbf16>
    %c0_5 = arith.constant 0 : index
    %c0_6 = arith.constant 0 : index
    %9 = vector.load %arg9[%c0_5, %c0_6] : memref<16x512xf32, #tpu.memory_space<vmem>>, vector<16x512xf32>
    %c0_7 = arith.constant 0 : index
    %c0_8 = arith.constant 0 : index
    %10 = vector.load %arg4[%c0_7, %c0_8] : memref<512x512xbf16, #tpu.memory_space<vmem>>, vector<512x512xbf16>
    %cst = arith.constant dense<0.000000e+00> : vector<16x512xf32>
    %11 = tpu.matmul %8, %10, %cst {dimension_numbers = #tpu.dot_dimension_numbers<[1], [0], [0], [1], [0, 0, 1, 1], [], []>} : vector<16x512xbf16>, vector<512x512xbf16>, vector<16x512xf32> -> vector<16x512xf32>
    %12 = arith.addf %9, %11 : vector<16x512xf32>
    %c0_9 = arith.constant 0 : index
    %c0_10 = arith.constant 0 : index
    %13 = vector.load %arg9[%c0_9, %c0_10] : memref<16x512xf32, #tpu.memory_space<vmem>>, vector<16x512xf32>
    tpu.vector_store %arg9[%c0_9, %c0_10], %12 {strides = array<i32>} : memref<16x512xf32, #tpu.memory_space<vmem>>, vector<16x512xf32>,
    %c0_i32_11 = arith.constant 0 : i32
    %14 = arith.cmpi eq, %arg1, %c0_i32_11 : i32
    %15 = arith.extui %14 : i1 to i32
    %c0_i32_12 = arith.constant 0 : i32
    %16 = arith.cmpi ne, %15, %c0_i32_12 : i32
    scf.if %16 {
      %c0_14 = arith.constant 0 : index
      %c0_15 = arith.constant 0 : index
      %20 = vector.load %arg10[%c0_14, %c0_15] : memref<16x4xf32, #tpu.memory_space<vmem>>, vector<16x4xf32>
      %c0_16 = arith.constant 0 : index
      %c0_17 = arith.constant 0 : index
      %21 = vector.load %arg6[%c0_16, %c0_17] : memref<512x4xbf16, #tpu.memory_space<vmem>>, vector<512x4xbf16>
      %cst_18 = arith.constant dense<0.000000e+00> : vector<16x4xf32>
      %22 = tpu.matmul %8, %21, %cst_18 {dimension_numbers = #tpu.dot_dimension_numbers<[1], [0], [0], [1], [0, 0, 1, 1], [], []>} : vector<16x512xbf16>, vector<512x4xbf16>, vector<16x4xf32> -> vector<16x4xf32>
      %23 = arith.addf %20, %22 : vector<16x4xf32>
      %c0_19 = arith.constant 0 : index
      %c0_20 = arith.constant 0 : index
      %24 = vector.load %arg10[%c0_19, %c0_20] : memref<16x4xf32, #tpu.memory_space<vmem>>, vector<16x4xf32>
      tpu.vector_store %arg10[%c0_19, %c0_20], %23 {strides = array<i32>} : memref<16x4xf32, #tpu.memory_space<vmem>>, vector<16x4xf32>,
    } else {
    }
    %c1_i32 = arith.constant 1 : i32
    %17 = arith.cmpi eq, %arg2, %c1_i32 : i32
    %18 = arith.extui %17 : i1 to i32
    %c0_i32_13 = arith.constant 0 : i32
    %19 = arith.cmpi ne, %18, %c0_i32_13 : i32
    scf.if %19 {
      %c0_14 = arith.constant 0 : index
      %c0_15 = arith.constant 0 : index
      %20 = vector.load %arg10[%c0_14, %c0_15] : memref<16x4xf32, #tpu.memory_space<vmem>>, vector<16x4xf32>
      %21 = arith.truncf %20 : vector<16x4xf32> to vector<16x4xbf16>
      %c0_16 = arith.constant 0 : index
      %c0_17 = arith.constant 0 : index
      %22 = vector.load %arg7[%c0_16, %c0_17] : memref<4x512xbf16, #tpu.memory_space<vmem>>, vector<4x512xbf16>
      %cst_18 = arith.constant dense<0.000000e+00> : vector<16x512xf32>
      %23 = tpu.matmul %21, %22, %cst_18 {dimension_numbers = #tpu.dot_dimension_numbers<[1], [0], [0], [1], [0, 0, 1, 1], [], []>} : vector<16x4xbf16>, vector<4x512xbf16>, vector<16x512xf32> -> vector<16x512xf32>
      %c0_19 = arith.constant 0 : index
      %c0_20 = arith.constant 0 : index
      %24 = vector.load %arg9[%c0_19, %c0_20] : memref<16x512xf32, #tpu.memory_space<vmem>>, vector<16x512xf32>
      %c0_21 = arith.constant 0 : index
      %c0_22 = arith.constant 0 : index
      %25 = vector.load %arg5[%c0_21, %c0_22] : memref<1x512xf32, #tpu.memory_space<vmem>>, vector<1x512xf32>
      %26 = vector.broadcast %25 : vector<1x512xf32> to vector<16x512xf32>
      %27 = arith.addf %24, %26 : vector<16x512xf32>
      %28 = arith.addf %27, %23 : vector<16x512xf32>
      %c0_23 = arith.constant 0 : index
      %c0_24 = arith.constant 0 : index
      %29 = vector.load %arg8[%c0_23, %c0_24] : memref<16x512xf32, #tpu.memory_space<vmem>>, vector<16x512xf32>
      tpu.vector_store %arg8[%c0_23, %c0_24], %28 {strides = array<i32>} : memref<16x512xf32, #tpu.memory_space<vmem>>, vector<16x512xf32>,
    } else {
    }
    return
  }
  func.func @transform_0(%arg0: i32, %arg1: i32, %arg2: i32) -> (i32, i32) {
    %c0_i32 = arith.constant 0 : i32
    return %arg0, %arg2 : i32, i32
  }
  func.func @transform_1(%arg0: i32, %arg1: i32, %arg2: i32) -> (i32, i32) {
    %c0_i32 = arith.constant 0 : i32
    return %arg2, %arg1 : i32, i32
  }
  func.func @transform_2(%arg0: i32, %arg1: i32, %arg2: i32) -> (i32, i32) {
    %c0_i32 = arith.constant 0 : i32
    %c0_i32_0 = arith.constant 0 : i32
    return %c0_i32, %arg1 : i32, i32
  }
  func.func @transform_3(%arg0: i32, %arg1: i32, %arg2: i32) -> (i32, i32) {
    %c0_i32 = arith.constant 0 : i32
    %c0_i32_0 = arith.constant 0 : i32
    return %arg2, %c0_i32 : i32, i32
  }
  func.func @transform_4(%arg0: i32, %arg1: i32, %arg2: i32) -> (i32, i32) {
    %c0_i32 = arith.constant 0 : i32
    %c0_i32_0 = arith.constant 0 : i32
    return %c0_i32, %arg1 : i32, i32
  }
  func.func @transform_5(%arg0: i32, %arg1: i32, %arg2: i32) -> (i32, i32) {
    %c0_i32 = arith.constant 0 : i32
    return %arg0, %arg1 : i32, i32
  }
}

</mosaic_0001>

<bundles_post_ra>
// kernel: tpu_custom_call.1
= control target key start
LH: loop header
LB: loop body
LE: loop exit
PB: predicated region body
PF: predicated region fallthrough
CT: control target
= control target key end

     0   :  { %s4113_s0 = inlined_call_operand.hbm [shape: bf16[16,1024], index: 0, kind: input, shape index: {}]   ;;  %s4114_s1 = inlined_call_operand.hbm [shape: bf16[1024,1024], index: 1, kind: input, shape index: {}]   ;;  %s4115_s2 = inlined_call_operand.hbm [shape: f32[1,1024], index: 2, kind: input, shape index: {}]   ;;  %s4116_s3 = inlined_call_operand.vmem [shape: bf16[1024,4], index: 3, kind: input, shape index: {}]   ;;  %s4117_s4 = inlined_call_operand.hbm [shape: bf16[4,1024], index: 4, kind: input, shape index: {}]   ;;  %s4118_s5 = inlined_call_operand.hbm [shape: f32[16,1024], index: 5, kind: output, shape index: {}]  }
   0x1   :  { %4130 = sst [smem:[#allocation31_spill]] %s4113_s0 }
   0x2   :  { %4131 = sst [smem:[#allocation32_spill]] %s4114_s1 }
   0x3   :  { %4132 = sst [smem:[#allocation33_spill]] %s4116_s3 }
   0x4   :  { %4133 = sst [smem:[#allocation34_spill]] %s4117_s4 }
   0x5   :  { %4134 = sst [smem:[#allocation35_spill]] %s4118_s5 }
   0x6   :  { %10 = vsyncpa [#allocation5], 0 }
   0x7   :  { %12 = vsyncpa [#allocation5 + $0x1], 0 }
   0x8   :  { %13 = vsyncpa [#allocation8], 0 }
   0x9   :  { %15 = vsyncpa [#allocation8 + $0x1], 0 }
   0xa   :  { %16 = vsyncpa [#allocation11], 0 }
   0xb   :  { %18 = vsyncpa [#allocation11 + $0x1], 0 }
   0xc   :  { %19 = vsyncpa [#allocation6], 0 }
   0xd   :  { %21 = vsyncpa [#allocation6 + $0x1], 0  ;;  %s3453_s18 = smov 0   ;;  %s3455_s19 = smov 0  }
   0xe   :  { %s3457_s20 = smov 0   ;;  %s3459_s21 = smov 0  }
   0xf   :  { %s3461_s22 = smov 0   ;;  %s3463_s23 = smov 0  }
  0x10   :  { %s3465_s24 = smov 0   ;;  %s3467_s25 = smov 0  }
  0x11   :  { %s3469_s26 = smov 0   ;;  %s3471_s27 = smov 0  }
  0x12   :  { %s3473_s28 = smov 0   ;;  %s3475_s29 = smov 0  }
  0x13   :  { %s3477_s30 = smov 0   ;;  %s3479_s6 = smov 0  }
  0x14 LB: > { %4135 = sst [smem:[#allocation18_spill]] %s3361_s18  ;;  %s39_s7 = sadd.s32 1, %s3405_s29  ;;  %s3413_s6 = sphi %s3479_s6, %s27_s6   ;;  %s3409_s30 = sphi %s3477_s30, %s4189_s30   ;;  %s3405_s29 = sphi %s3475_s29, %s4178_s29   ;;  %s3401_s28 = sphi %s3473_s28, %s4188_s28   ;;  %s3397_s27 = sphi %s3471_s27, %s4177_s27   ;;  %s3393_s26 = sphi %s3469_s26, %s4187_s26   ;;  %s3389_s25 = sphi %s3467_s25, %s4186_s25   ;;  %s3385_s24 = sphi %s3465_s24, %s4185_s24   ;;  %s3381_s23 = sphi %s3463_s23, %s4184_s23   ;;  %s3377_s22 = sphi %s3461_s22, %s4183_s22   ;;  %s3373_s21 = sphi %s3459_s21, %s4182_s21   ;;  %s3369_s20 = sphi %s3457_s20, %s4172_s20   ;;  %s3365_s19 = sphi %s3455_s19, %s4181_s19   ;;  %s3361_s18 = sphi %s3453_s18, %s4180_s18  }
  0x15   : > { %4136 = sst [smem:[#allocation19_spill]] %s3369_s20  ;;  %s42_s8 = sadd.s32 1, %s3409_s30 }
  0x16   : > { %4137 = sst [smem:[#allocation20_spill]] %s3381_s23  ;;  %p40_p0 = scmp.ge.s32.totalorder %s39_s7, 2 }
  0x17   : > { %4138 = sst [smem:[#allocation21_spill]] %s3393_s26  ;;  %p63_p1 = scmp.eq.s32.totalorder %s3413_s6, 0 }
  0x18   : > { %4139 = sst [smem:[#allocation22_spill]] %s3397_s27  ;;  %s83_s9 = sadd.s32 1, %s3381_s23 }
  0x19   : > { %4140 = sst [smem:[#allocation23_spill]] %s3401_s28  ;;  %p90_p2 = scmp.ne.s32.totalorder %s3381_s23, %s3377_s22 }
  0x1a   : > { %4141 = sst [smem:[#allocation24_spill]] %s3405_s29  ;;  %s4191_s7 = smov (%p40_p0, %s39_s7), 0 }
  0x1b   : > { %4142 = sst [smem:[#allocation25_spill]] %s4191_s7  ;;  %s4193_s8 = smov (!%p40_p0, %s42_s8), %s3409_s30 }
  0x1c   : > { %s3534_s10 = ssub.s32 %s3405_s29, %s4191_s7  ;;  %p3538_p3 = por %p90_p2, %p63_p1 }
  0x1d   : > { %p44_p4 = scmp.ge.s32.totalorder %s4193_s8, 2  ;;  %p53_p5 = scmp.eq.s32.totalorder %s3534_s10, 0 }
  0x1e   : > { %p96_p6 = scmp.ne.s32.totalorder %s3377_s22, %s3373_s21  ;;  %p3013_p7 = scmp.lt.s32.totalorder %s3413_s6, 4 }
  0x1f   : > { %s4195_s8 = smov (%p44_p4, %s4193_s8), 0  ;;  %s251_s14 = sand.u32 1, %s3413_s6  }
  0x20   : > { %4144 = sst [smem:[#allocation26_spill]] %s4195_s8  ;;  %s3550_s12 = ssub.s32 %s3409_s30, %s4195_s8 }
  0x21   : > { %s80_s13 = sor.u32 %s3550_s12, %s3534_s10  ;;  %s253_s15 = sand.u32 1, %s3381_s23  }
  0x22   : > { %p81_p8 = scmp.eq.s32.totalorder %s80_s13, 0  ;;  %s2132_s17 = sshll.u32 %s253_s15, 10 }
  0x23   : > { %s4123_s7 = sshll.u32 %s3409_s30, 2  ;;  %s2819_s5 = sshll.u32 %s3405_s29, 9 }
  0x24   : > { %s3557_s16 = scalar_select %p81_p8, %s3381_s23, %s83_s9  }
  0x25   : > { %s261_s28 = sadd.s32 %s2819_s5, %s4123_s7  ;;  %s255_s3 = scalar_lea.vmem [#allocation7], %s2132_s17 }
  0x26   : > { %4145 = sst [smem:[#allocation27_spill]] %s3557_s16  ;;  %s266_s27 = sshll.u32 %s255_s3, 4  ;;  %s267_s27 = int_to_ptr.vmem [resolvable:$true] %s266_s27 }
  0x27   : > { %s2136_s8 = sshll.u32 %s261_s28, 2  ;;  %s4146_s1 = sld [smem:[#allocation32_spill]] }
  0x28   : > { %p3000_p9 = pnand %p3013_p7, %p3538_p3  ;;  %p2142_p10 = scmp.ge.s32.totalorder %s3413_s6, 1 }
  0x29   : > { %s3571_s3 = scalar_lea.sflag [#allocation8], %s251_s14  ;;  %s3415_s28 = smov 512  }
  0x2a   : > { %s3416_s15 = smov 256   ;;  %s3417_s17 = smov 16  }
  0x2b   : > { %p322_p11 = scmp.lt.s32.totalorder %s3413_s6, 5  ;;  %p62_p13 = scmp.ne.s32.totalorder %s3393_s26, %s3389_s25 }
  0x2c   : > { %p68_p2 = scmp.ne.s32.totalorder %s3389_s25, %s3385_s24  ;;  %s226_s14 = sand.u32 1, %s3393_s26  }
  0x2d   : > { %s263_s9 = scalar_lea.hbm %s4146_s1, %s2136_s8  ;;  %p3575_p12 = pnand %p2142_p10, %p322_p11 }
  0x2e   : > { %s264_s5 = sshll.u32 %s263_s9, 4  ;;  %s55_s8 = sadd.s32 1, %s3393_s26  ;;  %s265_s5 = int_to_ptr.hbm [resolvable:$true] %s264_s5 }
  0x2f   : > { %3002 = dma.hbm_to_vmem [thread:$0]  (!%p3000_p9), %s265_s5, 16384, %s267_s27, %s3571_s3, %s3415_s28, %s3416_s15, %s3417_s17  }
  0x30   : > { %s3585_s11 = scalar_select %p53_p5, %s3393_s26, %s55_s8  }
  0x31   : > { %p64_p0 = por %p63_p1, %p62_p13  ;;  %s2818_s27 = sshll.u32 %s3405_s29, 4 }
  0x32   : > { %4148 = sst [smem:[#allocation28_spill]] %s3585_s11  ;;  %s2129_s13 = sshll.u32 %s226_s14, 5 }
  0x33   : > { %s4149_s0 = sld [smem:[#allocation31_spill]]  ;;  %s230_s7 = scalar_lea.vmem [#allocation4], %s2129_s13 }
  0x34   : > { %s241_s1 = sshll.u32 %s230_s7, 4  ;;  %p2997_p3 = pnand %p3013_p7, %p64_p0  ;;  %s242_s1 = int_to_ptr.vmem [resolvable:$true] %s241_s1 }
  0x35   : > { %s227_s29 = scalar_lea.sflag [#allocation5], %s226_s14  ;;  %s3599_s9 = sadd.s32 4294967295, %s3413_s6  }
  0x36   : > { %p69_p4 = scmp.eq.s32.totalorder %s3599_s9, 0  ;;  %p107_p5 = scmp.eq.s32.totalorder %s3550_s12, 0 }
  0x37   : > { %s109_s13 = sadd.s32 1, %s3369_s20  ;;  %p116_p8 = scmp.ne.s32.totalorder %s3369_s20, %s3365_s19 }
  0x38   : > { %p3610_p9 = por %p69_p4, %p68_p2  ;;  %p3617_p10 = por %p96_p6, %p69_p4 }
  0x39   : > { %s238_s10 = scalar_lea.hbm %s4149_s0, %s2818_s27  ;;  %s2126_s27 = sadd.s32 4294967294, %s3413_s6  }
  0x3a   : > { %s239_s8 = sshll.u32 %s238_s10, 4  ;;  %p3626_p11 = por %p116_p8, %p63_p1  ;;  %s240_s8 = int_to_ptr.hbm [resolvable:$true] %s239_s8 }
  0x3b   : > { %2999 = dma.hbm_to_vmem [thread:$0]  (!%p2997_p3), %s240_s8, 512, %s242_s1, %s227_s29, %s3415_s28, %s3416_s15, %s3417_s17  }
  0x3c   : > { %s3622_s1 = scalar_select %p107_p5, %s3369_s20, %s109_s13  }
  0x3d   : > { %p122_p13 = scmp.ne.s32.totalorder %s3365_s19, %s3361_s18  ;;  %p200_p0 = scmp.eq.s32.totalorder %s3599_s9, 3 }
  0x3e   : > { %4152 = sst [smem:[#allocation29_spill]] %s3622_s1  ;;  %p206_p2 = scmp.eq.s32.totalorder %s2126_s27, 3 }
  0x3f   : > { %p3633_p3 = por %p122_p13, %p69_p4  ;;  %s278_s24 = sand.u32 1, %s3369_s20  }
  0x40   : > { %p3638_p6 = por %p200_p0, %p116_p8  ;;  %p3642_p5 = por %p206_p2, %p122_p13 }
  0x41   : > { %s2137_s15 = sshll.u32 %s278_s24, 2  ;;  %s4158_s17 = sshll.u32 %s3409_s30, 2 }
  0x42   : > { %s4156_s28 = scalar_select %p3642_p5, 1, 0 }
  0x43   : > { %s284_s8 = scalar_lea.hbm %s4115_s2, %s4158_s17  ;;  %s280_s13 = scalar_lea.vmem [#allocation9], %s2137_s15 }
  0x44   : > { %4157 = sst [smem:[#allocation30_spill]] %s4156_s28  ;;  %s286_s27 = sshll.u32 %s284_s8, 4  ;;  %s287_s27 = int_to_ptr.hbm [resolvable:$true] %s286_s27 }
  0x45   : > { %s288_s0 = sshll.u32 %s280_s13, 4  ;;  %p3003_p1 = pnand %p3013_p7, %p3626_p11  ;;  %s289_s0 = int_to_ptr.vmem [resolvable:$true] %s288_s0 }
  0x46   : > { %s2139_s11 = sshll.u32 %s278_s24, 3  ;;  %s2820_s26 = sshll.u32 %s3409_s30, 3 }
  0x47   : > { %3005 = dma.hbm_to_vmem [thread:$0]  (!%p3003_p1), %s287_s27, 64, %s289_s0, %s3571_s3  }
  0x48   : > { %s308_s16 = scalar_lea.vmem [#allocation10], %s2139_s11  ;;  %s4159_s28 = sld [smem:[#allocation34_spill]] }
  0x49   : > { %s317_s23 = sshll.u32 %s308_s16, 4  ;;  %s305_s17 = scalar_lea.sflag [#allocation11], %s278_s24  ;;  %s318_s23 = int_to_ptr.vmem [resolvable:$true] %s317_s23 }
  0x4a   : > { %s328_s29 = sand.u32 (!%p3575_p12), 1, %s3389_s25  }
  0x4b   : > { %s2143_s15 = sshll.u32 (!%p3575_p12), %s328_s29, 5  ;;  %s329_s0 = scalar_lea.sflag (!%p3575_p12), [#allocation5], %s328_s29 }
  0x4c   : > { %326 = sbr.rel (%p3575_p12) target bundleno = 788 (0x314), region = 40  ;;  %s3663_s3 = scalar_lea.vmem (!%p3575_p12), [#allocation4], %s2143_s15 }
  0x4e   : > { %s313_s18 = scalar_lea.hbm %s4159_s28, %s2820_s26 }
  0x4f   : > { %s315_s5 = sshll.u32 %s313_s18, 4  ;;  %s316_s5 = int_to_ptr.hbm [resolvable:$true] %s315_s5 }
  0x50   : > { %3008 = dma.hbm_to_vmem [thread:$0]  (!%p3003_p1), %s316_s5, 128, %s318_s23, %s305_s17  }
  0x51   : > { %3340 = dma.done.wait (%p3610_p9), %s329_s0, 512  }
  0x52   : > { %3342 = vsyncadd (%p3610_p9), %s329_s0, 4294966784  ;;  %s338_s18 = sand.u32 1, %s3599_s9   ;;  %s340_s20 = sand.u32 1, %s3377_s22  }
  0x53   : > { %s2144_s23 = sshll.u32 %s340_s20, 10  ;;  %s339_s26 = scalar_lea.sflag [#allocation8], %s338_s18 }
  0x54   : > { %s3671_s16 = scalar_lea.vmem [#allocation7], %s2144_s23 }
  0x55   : > { %3344 = dma.done.wait (%p3617_p10), %s339_s26, 16384  }
  0x56   : > { %3346 = vsyncadd (%p3617_p10), %s339_s26, 4294950912  ;;  %s3678_s4 = sand.u32 1, %s3365_s19  }
  0x57   : > { %s2145_s11 = sshll.u32 %s3678_s4, 2 }
  0x58   : > { %s3681_s7 = scalar_lea.vmem [#allocation9], %s2145_s11 }
  0x59   : > { %3348 = dma.done.wait (%p3633_p3), %s339_s26, 64  }
  0x5a   : > { %3350 = vsyncadd (%p3633_p3), %s339_s26, 4294967232  ;;  %s2146_s9 = sshll.u32 %s3678_s4, 3  ;;  %s359_s1 = scalar_lea.sflag [#allocation11], %s3678_s4 }
  0x5b   : > { %s3689_s14 = scalar_lea.vmem [#allocation10], %s2146_s9 }
  0x5c   : > { %3352 = dma.done.wait (%p3633_p3), %s359_s1, 128  }
  0x5d   : > { %3354 = vsyncadd (%p3633_p3), %s359_s1, 4294967168  ;;  %s4160_s24 = sld [smem:[#allocation22_spill]]  ;;  %s2147_s28 = sshll.u32 %s3678_s4, 6 }
  0x5e   : > { %s4161_s5 = sld [smem:[#allocation33_spill]]  ;;  %s3703_s29 = scalar_lea.vmem [#allocation12], %s2147_s28 }
  0x63   : > { %s2148_s10 = sshll.u32 %s4160_s24, 6  ;;  %p425_p12 = scmp.eq.s32.totalorder %s4160_s24, 0 }
  0x64   : > { %p416_p7 = scmp.lt.s32.totalorder %s2148_s10, 127  ;;  %p2150_p4 = scmp.ne.s32.totalorder %s4160_s24, 0 }
  0x66   : > { %s4197_s10 = smov (!%p416_p7, %s2148_s10), 127  ;;  %428 = sbr.rel (%p2150_p4) target bundleno = 116 (0x74), region = 60 }
  0x67   : > { %s2149_s8 = sshll.u32 %s4197_s10, 2 }
  0x68   : > { %s3701_s17 = scalar_lea.vmem %s4161_s5, %s2149_s8 }
  0x6b   : > { %v3418_v0 = vmov 0.0  }
  0x6c   : > { %429 = vst [vmem:[#allocation2 + $0x30] sm:$0xff] %v3418_v0 }
  0x6d   : > { %430 = vst [vmem:[#allocation2] sm:$0xff] %v3418_v0 }
  0x6e   : > { %431 = vst [vmem:[#allocation2 + $0x18] sm:$0xff] %v3418_v0 }
  0x6f   : > { %432 = vst [vmem:[#allocation2 + $0x10] sm:$0xff] %v3418_v0 }
  0x70   : > { %433 = vst [vmem:[#allocation2 + $0x8] sm:$0xff] %v3418_v0 }
  0x71   : > { %434 = vst [vmem:[#allocation2 + $0x20] sm:$0xff] %v3418_v0 }
  0x72   : > { %435 = vst [vmem:[#allocation2 + $0x28] sm:$0xff] %v3418_v0 }
  0x73   : > { %436 = vst [vmem:[#allocation2 + $0x38] sm:$0xff] %v3418_v0 }
  0x74 PF: > { %s4162_s21 = sld [smem:[#allocation23_spill]] }
  0x7a   : > { %p437_p8 = scmp.eq.s32.totalorder %s4162_s21, 0 }
  0x7c   : > { %p438_p9 = pnand %p437_p8, %p425_p12 }
  0x7e   : > { %441 = sbr.rel (%p438_p9) target bundleno = 134 (0x86), region = 64 }
  0x83   : > { %vm442_vm0 = vcmask 31744   ;;  %v3419_v1 = vmov 0.0  }
  0x84   : > { %443 = vst.msk [vmem:[#allocation3] sm:$0xff] %vm442_vm0, %v3419_v1 }
  0x85   : > { %444 = vst.msk [vmem:[#allocation3 + $0x8] sm:$0xff] %vm442_vm0, %v3419_v1 }
  0x86 PF: > { %v2281_v2 = vld [vmem:[%s3671_s16 + $0xe0] sm:$0xf]  ;;  %v2855_v3 = vld [vmem:[%s3671_s16 + $0xec] sm:$0xf0]  ;;  %s4164_s0 = sld [smem:[#allocation23_spill]] }
  0x87   : > { %v2409_v4 = vld [vmem:[%s3671_s16 + $0x1e0] sm:$0xf]  ;;  %v2282_v5 = vor.u32 %v2855_v3, %v2281_v2  ;;  %v2887_v6 = vld [vmem:[%s3671_s16 + $0x1ec] sm:$0xf0] }
  0x88   : > { %v2537_v7 = vld [vmem:[%s3671_s16 + $0x2e0] sm:$0xf]  ;;  %v2919_v8 = vld [vmem:[%s3671_s16 + $0x2ec] sm:$0xf0]  ;;  %v2410_v9 = vor.u32 %v2887_v6, %v2409_v4 }
  0x89   : > { %v2538_v10 = vor.u32 %v2919_v8, %v2537_v7  ;;  %v2665_v11 = vld [vmem:[%s3671_s16 + $0x3e0] sm:$0xf]  ;;  %v2951_v12 = vld [vmem:[%s3671_s16 + $0x3ec] sm:$0xf0]  ;;  %1245 = vmatpush.bf16.msra.mxu0 %v2282_v5 }
  0x8a   : > { %v2265_v13 = vld [vmem:[%s3671_s16 + $0xc0] sm:$0xf]  ;;  %v2666_v14 = vor.u32 %v2951_v12, %v2665_v11  ;;  %v2851_v15 = vld [vmem:[%s3671_s16 + $0xcc] sm:$0xf0]  ;;  %1259 = vmatpush.bf16.msra.mxu1 %v2410_v9 }
  0x8b   : > { %v2393_v16 = vld [vmem:[%s3671_s16 + $0x1c0] sm:$0xf]  ;;  %v2883_v17 = vld [vmem:[%s3671_s16 + $0x1cc] sm:$0xf0]  ;;  %1273 = vmatpush.bf16.msra.mxu2 %v2538_v10  ;;  %v2266_v18 = vor.u32 %v2851_v15, %v2265_v13 }
  0x8c   : > { %v2394_v19 = vor.u32 %v2883_v17, %v2393_v16  ;;  %v2521_v20 = vld [vmem:[%s3671_s16 + $0x2c0] sm:$0xf]  ;;  %v2915_v21 = vld [vmem:[%s3671_s16 + $0x2cc] sm:$0xf0]  ;;  %1287 = vmatpush.bf16.msra.mxu3 %v2666_v14  ;;  %p2679_p10 = scmp.ne.s32.totalorder %s4164_s0, 0 }
  0x8d   : > { %v2649_v22 = vld [vmem:[%s3671_s16 + $0x3c0] sm:$0xf]  ;;  %v2522_v23 = vor.u32 %v2915_v21, %v2521_v20  ;;  %v2947_v24 = vld [vmem:[%s3671_s16 + $0x3cc] sm:$0xf0]  ;;  %1246 = vmatpush.bf16.msra.mxu0 %v2266_v18 }
  0x8e   : > { %v2249_v25 = vld [vmem:[%s3671_s16 + $0xa0] sm:$0xf]  ;;  %v2847_v26 = vld [vmem:[%s3671_s16 + $0xac] sm:$0xf0]  ;;  %v2650_v27 = vor.u32 %v2947_v24, %v2649_v22  ;;  %1260 = vmatpush.bf16.msra.mxu1 %v2394_v19 }
  0x8f   : > { %v2377_v28 = vld [vmem:[%s3671_s16 + $0x1a0] sm:$0xf]  ;;  %v2879_v29 = vld [vmem:[%s3671_s16 + $0x1ac] sm:$0xf0]  ;;  %v2250_v31 = vor.u32 %v2847_v26, %v2249_v25  ;;  %1274 = vmatpush.bf16.msra.mxu2 %v2522_v23 }
  0x90   : > { %v2505_v30 = vld [vmem:[%s3671_s16 + $0x2a0] sm:$0xf]  ;;  %v2911_v32 = vld [vmem:[%s3671_s16 + $0x2ac] sm:$0xf0]  ;;  %v2378_v35 = vor.u32 %v2879_v29, %v2377_v28  ;;  %1288 = vmatpush.bf16.msra.mxu3 %v2650_v27 }
  0x91   : > { %v2633_v33 = vld [vmem:[%s3671_s16 + $0x3a0] sm:$0xf]  ;;  %v2943_v34 = vld [vmem:[%s3671_s16 + $0x3ac] sm:$0xf0]  ;;  %v2506_v36 = vor.u32 %v2911_v32, %v2505_v30  ;;  %1247 = vmatpush.bf16.msra.mxu0 %v2250_v31  ;;  %v2853_v30 = vld [vmem:[%s3671_s16 + $0xe4] sm:$0xf] }
  0x92   : > { %v2233_v37 = vld [vmem:[%s3671_s16 + $0x80] sm:$0xf]  ;;  %v2843_v38 = vld [vmem:[%s3671_s16 + $0x8c] sm:$0xf0]  ;;  %v2634_v40 = vor.u32 %v2943_v34, %v2633_v33  ;;  %1261 = vmatpush.bf16.msra.mxu1 %v2378_v35  ;;  %v2283_v31 = vld [vmem:[%s3671_s16 + $0xf0] sm:$0xf0] }
  0x93   : > { %v2361_v39 = vld [vmem:[%s3671_s16 + $0x180] sm:$0xf]  ;;  %v2875_v41 = vld [vmem:[%s3671_s16 + $0x18c] sm:$0xf0]  ;;  %v2234_v46 = vor.u32 %v2843_v38, %v2233_v37  ;;  %1275 = vmatpush.bf16.msra.mxu2 %v2506_v36  ;;  %v2885_v32 = vld [vmem:[%s3671_s16 + $0x1e4] sm:$0xf] }
  0x94   : > { %v2489_v42 = vld [vmem:[%s3671_s16 + $0x280] sm:$0xf]  ;;  %v2907_v43 = vld [vmem:[%s3671_s16 + $0x28c] sm:$0xf0]  ;;  %v2362_v47 = vor.u32 %v2875_v41, %v2361_v39  ;;  %1289 = vmatpush.bf16.msra.mxu3 %v2634_v40  ;;  %v2411_v34 = vld [vmem:[%s3671_s16 + $0x1f0] sm:$0xf0] }
  0x95   : > { %v2617_v44 = vld [vmem:[%s3671_s16 + $0x380] sm:$0xf]  ;;  %v2939_v45 = vld [vmem:[%s3671_s16 + $0x38c] sm:$0xf0]  ;;  %v2490_v48 = vor.u32 %v2907_v43, %v2489_v42  ;;  %1248 = vmatpush.bf16.msra.mxu0 %v2234_v46  ;;  %v2917_v35 = vld [vmem:[%s3671_s16 + $0x2e4] sm:$0xf]  ;;  %v2286_v42 = vor.u32 %v2853_v30, %v2283_v31  ;;  %v2414_v43 = vor.u32 %v2885_v32, %v2411_v34 }
  0x96   : > { %v2217_v49 = vld [vmem:[%s3671_s16 + $0x60] sm:$0xf]  ;;  %v2839_v50 = vld [vmem:[%s3671_s16 + $0x6c] sm:$0xf0]  ;;  %v2618_v52 = vor.u32 %v2939_v45, %v2617_v44  ;;  %1262 = vmatpush.bf16.msra.mxu1 %v2362_v47  ;;  %v2539_v36 = vld [vmem:[%s3671_s16 + $0x2f0] sm:$0xf0] }
  0x97   : > { %v2345_v51 = vld [vmem:[%s3671_s16 + $0x160] sm:$0xf]  ;;  %v2871_v53 = vld [vmem:[%s3671_s16 + $0x16c] sm:$0xf0]  ;;  %v2218_v58 = vor.u32 %v2839_v50, %v2217_v49  ;;  %1276 = vmatpush.bf16.msra.mxu2 %v2490_v48  ;;  %v2949_v39 = vld [vmem:[%s3671_s16 + $0x3e4] sm:$0xf]  ;;  %v2542_v44 = vor.u32 %v2917_v35, %v2539_v36 }
  0x98   : > { %v2473_v54 = vld [vmem:[%s3671_s16 + $0x260] sm:$0xf]  ;;  %v2903_v55 = vld [vmem:[%s3671_s16 + $0x26c] sm:$0xf0]  ;;  %v2346_v59 = vor.u32 %v2871_v53, %v2345_v51  ;;  %1290 = vmatpush.bf16.msra.mxu3 %v2618_v52  ;;  %v2667_v40 = vld [vmem:[%s3671_s16 + $0x3f0] sm:$0xf0] }
  0x99   : > { %v2601_v56 = vld [vmem:[%s3671_s16 + $0x360] sm:$0xf]  ;;  %v2935_v57 = vld [vmem:[%s3671_s16 + $0x36c] sm:$0xf0]  ;;  %v2474_v60 = vor.u32 %v2903_v55, %v2473_v54  ;;  %1249 = vmatpush.bf16.msra.mxu0 %v2218_v58  ;;  %v2849_v45 = vld [vmem:[%s3671_s16 + $0xc4] sm:$0xf]  ;;  %v2670_v48 = vor.u32 %v2949_v39, %v2667_v40 }
  0x9a   : > { %v2201_v61 = vld [vmem:[%s3671_s16 + $0x40] sm:$0xf]  ;;  %v2835_v62 = vld [vmem:[%s3671_s16 + $0x4c] sm:$0xf0]  ;;  %v2602_v0 = vor.u32 %v2935_v57, %v2601_v56  ;;  %1263 = vmatpush.bf16.msra.mxu1 %v2346_v59  ;;  %v2267_v46 = vld [vmem:[%s3671_s16 + $0xd0] sm:$0xf0] }
  0x9b   : > { %v2329_v63 = vld [vmem:[%s3671_s16 + $0x140] sm:$0xf]  ;;  %v2867_v1 = vld [vmem:[%s3671_s16 + $0x14c] sm:$0xf0]  ;;  %v2202_v6 = vor.u32 %v2835_v62, %v2201_v61  ;;  %1277 = vmatpush.bf16.msra.mxu2 %v2474_v60  ;;  %v2881_v47 = vld [vmem:[%s3671_s16 + $0x1c4] sm:$0xf]  ;;  %v2270_v54 = vor.u32 %v2849_v45, %v2267_v46 }
  0x9c   : > { %v2457_v2 = vld [vmem:[%s3671_s16 + $0x240] sm:$0xf]  ;;  %v2899_v3 = vld [vmem:[%s3671_s16 + $0x24c] sm:$0xf0]  ;;  %v2330_v7 = vor.u32 %v2867_v1, %v2329_v63  ;;  %1291 = vmatpush.bf16.msra.mxu3 %v2602_v0  ;;  %v2395_v49 = vld [vmem:[%s3671_s16 + $0x1d0] sm:$0xf0] }
  0x9d   : > { %v2585_v4 = vld [vmem:[%s3671_s16 + $0x340] sm:$0xf]  ;;  %v2931_v5 = vld [vmem:[%s3671_s16 + $0x34c] sm:$0xf0]  ;;  %v2458_v8 = vor.u32 %v2899_v3, %v2457_v2  ;;  %1250 = vmatpush.bf16.msra.mxu0 %v2202_v6  ;;  %v2913_v50 = vld [vmem:[%s3671_s16 + $0x2c4] sm:$0xf]  ;;  %v2398_v55 = vor.u32 %v2881_v47, %v2395_v49 }
  0x9e   : > { %v2185_v9 = vld [vmem:[%s3671_s16 + $0x20] sm:$0xf]  ;;  %v2831_v10 = vld [vmem:[%s3671_s16 + $0x2c] sm:$0xf0]  ;;  %v2586_v12 = vor.u32 %v2931_v5, %v2585_v4  ;;  %1264 = vmatpush.bf16.msra.mxu1 %v2330_v7  ;;  %v2523_v51 = vld [vmem:[%s3671_s16 + $0x2d0] sm:$0xf0] }
  0x9f   : > { %v2313_v11 = vld [vmem:[%s3671_s16 + $0x120] sm:$0xf]  ;;  %v2863_v13 = vld [vmem:[%s3671_s16 + $0x12c] sm:$0xf0]  ;;  %v2186_v18 = vor.u32 %v2831_v10, %v2185_v9  ;;  %1278 = vmatpush.bf16.msra.mxu2 %v2458_v8  ;;  %v2945_v52 = vld [vmem:[%s3671_s16 + $0x3c4] sm:$0xf]  ;;  %v2526_v56 = vor.u32 %v2913_v50, %v2523_v51 }
  0xa0   : > { %v2441_v14 = vld [vmem:[%s3671_s16 + $0x220] sm:$0xf]  ;;  %v2895_v15 = vld [vmem:[%s3671_s16 + $0x22c] sm:$0xf0]  ;;  %v2314_v21 = vor.u32 %v2863_v13, %v2313_v11  ;;  %1292 = vmatpush.bf16.msra.mxu3 %v2586_v12  ;;  %v2651_v53 = vld [vmem:[%s3671_s16 + $0x3d0] sm:$0xf0] }
  0xa1   : > { %v2569_v16 = vld [vmem:[%s3671_s16 + $0x320] sm:$0xf]  ;;  %v2927_v17 = vld [vmem:[%s3671_s16 + $0x32c] sm:$0xf0]  ;;  %v2442_v22 = vor.u32 %v2895_v15, %v2441_v14  ;;  %1251 = vmatpush.bf16.msra.mxu0 %v2186_v18  ;;  %v2845_v57 = vld [vmem:[%s3671_s16 + $0xa4] sm:$0xf]  ;;  %v2654_v60 = vor.u32 %v2945_v52, %v2651_v53 }
  0xa2   : > { %v2169_v19 = vld [vmem:[%s3671_s16] sm:$0xf]  ;;  %v2827_v20 = vld [vmem:[%s3671_s16 + $0xc] sm:$0xf0]  ;;  %v2570_v26 = vor.u32 %v2927_v17, %v2569_v16  ;;  %1265 = vmatpush.bf16.msra.mxu1 %v2314_v21  ;;  %v2251_v58 = vld [vmem:[%s3671_s16 + $0xb0] sm:$0xf0] }
  0xa3   : > { %v2297_v23 = vld [vmem:[%s3671_s16 + $0x100] sm:$0xf]  ;;  %v2859_v24 = vld [vmem:[%s3671_s16 + $0x10c] sm:$0xf0]  ;;  %v2170_v33 = vor.u32 %v2827_v20, %v2169_v19  ;;  %1279 = vmatpush.bf16.msra.mxu2 %v2442_v22  ;;  %v2877_v59 = vld [vmem:[%s3671_s16 + $0x1a4] sm:$0xf]  ;;  %v2254_v3 = vor.u32 %v2845_v57, %v2251_v58 }
  0xa4   : > { %v2425_v25 = vld [vmem:[%s3671_s16 + $0x200] sm:$0xf]  ;;  %v2891_v27 = vld [vmem:[%s3671_s16 + $0x20c] sm:$0xf0]  ;;  %v2298_v37 = vor.u32 %v2859_v24, %v2297_v23  ;;  %1293 = vmatpush.bf16.msra.mxu3 %v2570_v26  ;;  %v2379_v61 = vld [vmem:[%s3671_s16 + $0x1b0] sm:$0xf0] }
  0xa5   : > { %v2553_v28 = vld [vmem:[%s3671_s16 + $0x300] sm:$0xf]  ;;  %v2923_v29 = vld [vmem:[%s3671_s16 + $0x30c] sm:$0xf0]  ;;  %v2426_v38 = vor.u32 %v2891_v27, %v2425_v25  ;;  %1252 = vmatpush.bf16.msra.mxu0 %v2170_v33  ;;  %v2909_v62 = vld [vmem:[%s3671_s16 + $0x2a4] sm:$0xf]  ;;  %v2382_v7 = vor.u32 %v2877_v59, %v2379_v61 }
  0xa6   : > { %v2554_v41 = vor.u32 %v2923_v29, %v2553_v28  ;;  %1266 = vmatpush.bf16.msra.mxu1 %v2298_v37  ;;  %v2507_v63 = vld [vmem:[%s3671_s16 + $0x2b0] sm:$0xf0]  ;;  %v2941_v0 = vld [vmem:[%s3671_s16 + $0x3a4] sm:$0xf]  ;;  %v2161_v5 = vld [vmem:[%s3663_s3 + $0x8] sm:$0xf] }
  0xa7   : > { %1280 = vmatpush.bf16.msra.mxu2 %v2426_v38  ;;  %v2635_v1 = vld [vmem:[%s3671_s16 + $0x3b0] sm:$0xf0]  ;;  %v2841_v2 = vld [vmem:[%s3671_s16 + $0x84] sm:$0xf]  ;;  %v2824_v6 = vld [vmem:[%s3663_s3 + $0x14] sm:$0xf0]  ;;  %v2510_v8 = vor.u32 %v2909_v62, %v2507_v63 }
  0xa8   : > { %1294 = vmatpush.bf16.msra.mxu3 %v2554_v41  ;;  %v2235_v4 = vld [vmem:[%s3671_s16 + $0x90] sm:$0xf0]  ;;  %v2873_v9 = vld [vmem:[%s3671_s16 + $0x184] sm:$0xf]  ;;  %v3802_v10 = vor.u32 %v2824_v6, %v2161_v5  ;;  %v2822_v11 = vld [vmem:[%s3663_s3 + $0xc] sm:$0xf]  ;;  %v2638_v13 = vor.u32 %v2941_v0, %v2635_v1 }
  0xa9   : > { %1301 = vmatpush.bf16.msrb.mxu0 %v2286_v42  ;;  %v2163_v12 = vld [vmem:[%s3663_s3 + $0x18] sm:$0xf0]  ;;  %v2363_v14 = vld [vmem:[%s3671_s16 + $0x190] sm:$0xf0]  ;;  %v2905_v15 = vld [vmem:[%s3671_s16 + $0x284] sm:$0xf]  ;;  %v2238_v21 = vor.u32 %v2841_v2, %v2235_v4 }
  0xaa   : > { %1315 = vmatpush.bf16.msrb.mxu1 %v2414_v43  ;;  %v2491_v16 = vld [vmem:[%s3671_s16 + $0x290] sm:$0xf0]  ;;  %v3809_v17 = vor.u32 %v2822_v11, %v2163_v12  ;;  %v2937_v18 = vld [vmem:[%s3671_s16 + $0x384] sm:$0xf]  ;;  %1281 = vmatmul.bf16.vlgmr.msra.gmra.mxu2 %v3802_v10  ;;  %v2153_v23 = vld [vmem:[%s3663_s3] sm:$0xf]  ;;  %v2366_v25 = vor.u32 %v2873_v9, %v2363_v14 }
  0xab   : > { %1329 = vmatpush.bf16.msrb.mxu2 %v2542_v44  ;;  %v2619_v19 = vld [vmem:[%s3671_s16 + $0x390] sm:$0xf0]  ;;  %v2837_v20 = vld [vmem:[%s3671_s16 + $0x64] sm:$0xf]  ;;  %v2823_v24 = vld [vmem:[%s3663_s3 + $0xc] sm:$0xf0]  ;;  %v2494_v26 = vor.u32 %v2905_v15, %v2491_v16 }
  0xac   : > { %1343 = vmatpush.bf16.msrb.mxu3 %v2670_v48  ;;  %v2219_v22 = vld [vmem:[%s3671_s16 + $0x70] sm:$0xf0]  ;;  %v2869_v27 = vld [vmem:[%s3671_s16 + $0x164] sm:$0xf]  ;;  %v3820_v28 = vor.u32 %v2823_v24, %v2153_v23  ;;  %v2622_v31 = vor.u32 %v2937_v18, %v2619_v19  ;;  %v2289_v11 = vld [vmem:[%s3671_s16 + $0xe8] sm:$0xf] }
  0xad   : > { %1302 = vmatpush.bf16.msrb.mxu0 %v2270_v54  ;;  %1295 = vmatmul.bf16.vlgmr.msra.gmra.mxu3 %v3809_v17  ;;  %v2821_v29 = vld [vmem:[%s3663_s3 + $0x4] sm:$0xf]  ;;  %v2155_v30 = vld [vmem:[%s3663_s3 + $0x10] sm:$0xf0]  ;;  %v2222_v38 = vor.u32 %v2837_v20, %v2219_v22  ;;  %v2856_v12 = vld [vmem:[%s3671_s16 + $0xf4] sm:$0xf0] }
  0xae   : > { %1316 = vmatpush.bf16.msrb.mxu1 %v2398_v55  ;;  %v2347_v32 = vld [vmem:[%s3671_s16 + $0x170] sm:$0xf0]  ;;  %v2901_v33 = vld [vmem:[%s3671_s16 + $0x264] sm:$0xf]  ;;  %v3827_v35 = vor.u32 %v2821_v29, %v2155_v30  ;;  %1253 = vmatmul.bf16.vlgmr.msra.gmra.mxu0 %v3820_v28  ;;  %v2888_v15 = vld [vmem:[%s3671_s16 + $0x1f4] sm:$0xf0]  ;;  %v2290_v24 = vor.u32 %v2856_v12, %v2289_v11 }
  0xaf   : > { %1330 = vmatpush.bf16.msrb.mxu2 %v2526_v56  ;;  %v2475_v34 = vld [vmem:[%s3671_s16 + $0x270] sm:$0xf0]  ;;  %v2933_v36 = vld [vmem:[%s3671_s16 + $0x364] sm:$0xf]  ;;  %v2350_v39 = vor.u32 %v2869_v27, %v2347_v32  ;;  %v2545_v16 = vld [vmem:[%s3671_s16 + $0x2e8] sm:$0xf] }
  0xb0   : > { %1344 = vmatpush.bf16.msrb.mxu3 %v2654_v60  ;;  %v2603_v37 = vld [vmem:[%s3671_s16 + $0x370] sm:$0xf0]  ;;  %1267 = vmatmul.bf16.vlgmr.msra.gmra.mxu1 %v3827_v35  ;;  %v2478_v40 = vor.u32 %v2901_v33, %v2475_v34  ;;  %v2833_v41 = vld [vmem:[%s3671_s16 + $0x44] sm:$0xf]  ;;  %v2920_v18 = vld [vmem:[%s3671_s16 + $0x2f4] sm:$0xf0] }
  0xb1   : > { %1303 = vmatpush.bf16.msrb.mxu0 %v2254_v3  ;;  %v2203_v42 = vld [vmem:[%s3671_s16 + $0x50] sm:$0xf0]  ;;  %v2865_v43 = vld [vmem:[%s3671_s16 + $0x144] sm:$0xf]  ;;  %v2606_v44 = vor.u32 %v2933_v36, %v2603_v37  ;;  %v2952_v22 = vld [vmem:[%s3671_s16 + $0x3f4] sm:$0xf0] }
  0xb2   : > { %1317 = vmatpush.bf16.msrb.mxu1 %v2382_v7  ;;  %v2331_v45 = vld [vmem:[%s3671_s16 + $0x150] sm:$0xf0]  ;;  %v2897_v46 = vld [vmem:[%s3671_s16 + $0x244] sm:$0xf]  ;;  %v2206_v50 = vor.u32 %v2833_v41, %v2203_v42  ;;  %v2273_v27 = vld [vmem:[%s3671_s16 + $0xc8] sm:$0xf] }
  0xb3   : > { %1331 = vmatpush.bf16.msrb.mxu2 %v2510_v8  ;;  %v2459_v47 = vld [vmem:[%s3671_s16 + $0x250] sm:$0xf0]  ;;  %v2929_v48 = vld [vmem:[%s3671_s16 + $0x344] sm:$0xf]  ;;  %v2334_v51 = vor.u32 %v2865_v43, %v2331_v45  ;;  %v2852_v29 = vld [vmem:[%s3671_s16 + $0xd4] sm:$0xf0] }
  0xb4   : > { %1345 = vmatpush.bf16.msrb.mxu3 %v2638_v13  ;;  %v2587_v49 = vld [vmem:[%s3671_s16 + $0x350] sm:$0xf0]  ;;  %v2462_v52 = vor.u32 %v2897_v46, %v2459_v47  ;;  %v2829_v53 = vld [vmem:[%s3671_s16 + $0x24] sm:$0xf]  ;;  %v2417_v13 = vld [vmem:[%s3671_s16 + $0x1e8] sm:$0xf] }
  0xb5   : > { %1304 = vmatpush.bf16.msrb.mxu0 %v2238_v21  ;;  %v2187_v54 = vld [vmem:[%s3671_s16 + $0x30] sm:$0xf0]  ;;  %v2861_v55 = vld [vmem:[%s3671_s16 + $0x124] sm:$0xf]  ;;  %v2590_v56 = vor.u32 %v2929_v48, %v2587_v49  ;;  %v2673_v21 = vld [vmem:[%s3671_s16 + $0x3e8] sm:$0xf] }
  0xb6   : > { %1318 = vmatpush.bf16.msrb.mxu1 %v2366_v25  ;;  %v2315_v57 = vld [vmem:[%s3671_s16 + $0x130] sm:$0xf0]  ;;  %v2893_v58 = vld [vmem:[%s3671_s16 + $0x224] sm:$0xf]  ;;  %v2190_v62 = vor.u32 %v2829_v53, %v2187_v54  ;;  %v2418_v25 = vor.u32 %v2888_v15, %v2417_v13  ;;  %v2401_v30 = vld [vmem:[%s3671_s16 + $0x1c8] sm:$0xf] }
  0xb7   : > { %1332 = vmatpush.bf16.msrb.mxu2 %v2494_v26  ;;  %v2443_v59 = vld [vmem:[%s3671_s16 + $0x230] sm:$0xf0]  ;;  %v2925_v60 = vld [vmem:[%s3671_s16 + $0x324] sm:$0xf]  ;;  %v2318_v1 = vor.u32 %v2861_v55, %v2315_v57  ;;  %v2546_v26 = vor.u32 %v2920_v18, %v2545_v16  ;;  %v2884_v32 = vld [vmem:[%s3671_s16 + $0x1d4] sm:$0xf0] }
  0xb8   : > { %1346 = vmatpush.bf16.msrb.mxu3 %v2622_v31  ;;  %v2571_v61 = vld [vmem:[%s3671_s16 + $0x330] sm:$0xf0]  ;;  %v2825_v63 = vld [vmem:[%s3671_s16 + $0x4] sm:$0xf]  ;;  %v2446_v2 = vor.u32 %v2893_v58, %v2443_v59  ;;  %v2674_v31 = vor.u32 %v2952_v22, %v2673_v21  ;;  %v2529_v33 = vld [vmem:[%s3671_s16 + $0x2c8] sm:$0xf] }
  0xb9   : > { %1305 = vmatpush.bf16.msrb.mxu0 %v2222_v38  ;;  %v2171_v0 = vld [vmem:[%s3671_s16 + $0x10] sm:$0xf0]  ;;  %v2857_v3 = vld [vmem:[%s3671_s16 + $0x104] sm:$0xf]  ;;  %v2574_v6 = vor.u32 %v2925_v60, %v2571_v61  ;;  %v2916_v34 = vld [vmem:[%s3671_s16 + $0x2d4] sm:$0xf0]  ;;  %v2274_v38 = vor.u32 %v2852_v29, %v2273_v27 }
  0xba   : > { %1319 = vmatpush.bf16.msrb.mxu1 %v2350_v39  ;;  %v2299_v4 = vld [vmem:[%s3671_s16 + $0x110] sm:$0xf0]  ;;  %v2889_v5 = vld [vmem:[%s3671_s16 + $0x204] sm:$0xf]  ;;  %v2174_v14 = vor.u32 %v2825_v63, %v2171_v0  ;;  %v2657_v36 = vld [vmem:[%s3671_s16 + $0x3c8] sm:$0xf]  ;;  %v2402_v39 = vor.u32 %v2884_v32, %v2401_v30 }
  0xbb   : > { %1333 = vmatpush.bf16.msrb.mxu2 %v2478_v40  ;;  %v2427_v7 = vld [vmem:[%s3671_s16 + $0x210] sm:$0xf0]  ;;  %v2921_v8 = vld [vmem:[%s3671_s16 + $0x304] sm:$0xf]  ;;  %v2302_v19 = vor.u32 %v2857_v3, %v2299_v4  ;;  %v2948_v37 = vld [vmem:[%s3671_s16 + $0x3d4] sm:$0xf0]  ;;  %v2530_v40 = vor.u32 %v2916_v34, %v2529_v33 }
  0xbc   : > { %1347 = vmatpush.bf16.msrb.mxu3 %v2606_v44  ;;  %v2555_v9 = vld [vmem:[%s3671_s16 + $0x310] sm:$0xf0]  ;;  %v2430_v20 = vor.u32 %v2889_v5, %v2427_v7  ;;  %v2257_v41 = vld [vmem:[%s3671_s16 + $0xa8] sm:$0xf]  ;;  %v2848_v42 = vld [vmem:[%s3671_s16 + $0xb4] sm:$0xf0]  ;;  %v2658_v44 = vor.u32 %v2948_v37, %v2657_v36 }
  0xbd   : > { %1306 = vmatpush.bf16.msrb.mxu0 %v2206_v50  ;;  %v2558_v23 = vor.u32 %v2921_v8, %v2555_v9  ;;  %v2385_v43 = vld [vmem:[%s3671_s16 + $0x1a8] sm:$0xf]  ;;  %v2880_v45 = vld [vmem:[%s3671_s16 + $0x1b4] sm:$0xf0]  ;;  %v2258_v50 = vor.u32 %v2848_v42, %v2257_v41 }
  0xbe   : > { %1320 = vmatpush.bf16.msrb.mxu1 %v2334_v51  ;;  %v2513_v46 = vld [vmem:[%s3671_s16 + $0x2a8] sm:$0xf]  ;;  %v2912_v47 = vld [vmem:[%s3671_s16 + $0x2b4] sm:$0xf0]  ;;  %v2386_v51 = vor.u32 %v2880_v45, %v2385_v43 }
  0xbf   : > { %1334 = vmatpush.bf16.msrb.mxu2 %v2462_v52  ;;  %v2641_v48 = vld [vmem:[%s3671_s16 + $0x3a8] sm:$0xf]  ;;  %v2944_v49 = vld [vmem:[%s3671_s16 + $0x3b4] sm:$0xf0]  ;;  %v2514_v52 = vor.u32 %v2912_v47, %v2513_v46 }
  0xc0   : > { %1348 = vmatpush.bf16.msrb.mxu3 %v2590_v56  ;;  %v2241_v53 = vld [vmem:[%s3671_s16 + $0x88] sm:$0xf]  ;;  %v2844_v54 = vld [vmem:[%s3671_s16 + $0x94] sm:$0xf0]  ;;  %v2642_v56 = vor.u32 %v2944_v49, %v2641_v48 }
  0xc1   : > { %1307 = vmatpush.bf16.msrb.mxu0 %v2190_v62  ;;  %v2369_v55 = vld [vmem:[%s3671_s16 + $0x188] sm:$0xf]  ;;  %v2876_v57 = vld [vmem:[%s3671_s16 + $0x194] sm:$0xf0]  ;;  %v2242_v62 = vor.u32 %v2844_v54, %v2241_v53  ;;  %v2419_v54 = vld [vmem:[%s3671_s16 + $0x1f8] sm:$0xf0] }
  0xc2   : > { %1321 = vmatpush.bf16.msrb.mxu1 %v2318_v1  ;;  %v2497_v58 = vld [vmem:[%s3671_s16 + $0x288] sm:$0xf]  ;;  %v2908_v59 = vld [vmem:[%s3671_s16 + $0x294] sm:$0xf0]  ;;  %v2370_v63 = vor.u32 %v2876_v57, %v2369_v55  ;;  %v2918_v55 = vld [vmem:[%s3671_s16 + $0x2ec] sm:$0xf] }
  0xc3   : > { %1335 = vmatpush.bf16.msrb.mxu2 %v2446_v2  ;;  %v2625_v60 = vld [vmem:[%s3671_s16 + $0x388] sm:$0xf]  ;;  %v2940_v61 = vld [vmem:[%s3671_s16 + $0x394] sm:$0xf0]  ;;  %v2498_v0 = vor.u32 %v2908_v59, %v2497_v58  ;;  %v2950_v59 = vld [vmem:[%s3671_s16 + $0x3ec] sm:$0xf] }
  0xc4   : > { %1349 = vmatpush.bf16.msrb.mxu3 %v2574_v6  ;;  %v2225_v1 = vld [vmem:[%s3671_s16 + $0x68] sm:$0xf]  ;;  %v2840_v2 = vld [vmem:[%s3671_s16 + $0x74] sm:$0xf0]  ;;  %v2626_v4 = vor.u32 %v2940_v61, %v2625_v60  ;;  %v2675_v60 = vld [vmem:[%s3671_s16 + $0x3f8] sm:$0xf0] }
  0xc5   : > { %1308 = vmatpush.bf16.msrb.mxu0 %v2174_v14  ;;  %v2353_v3 = vld [vmem:[%s3671_s16 + $0x168] sm:$0xf]  ;;  %v2872_v5 = vld [vmem:[%s3671_s16 + $0x174] sm:$0xf0]  ;;  %v2226_v11 = vor.u32 %v2840_v2, %v2225_v1  ;;  %v2850_v1 = vld [vmem:[%s3671_s16 + $0xcc] sm:$0xf] }
  0xc6   : > { %1322 = vmatpush.bf16.msrb.mxu1 %v2302_v19  ;;  %v2481_v6 = vld [vmem:[%s3671_s16 + $0x268] sm:$0xf]  ;;  %v2904_v7 = vld [vmem:[%s3671_s16 + $0x274] sm:$0xf0]  ;;  %v2354_v12 = vor.u32 %v2872_v5, %v2353_v3  ;;  %v2275_v2 = vld [vmem:[%s3671_s16 + $0xd8] sm:$0xf0] }
  0xc7   : > { %1336 = vmatpush.bf16.msrb.mxu2 %v2430_v20  ;;  %v2609_v8 = vld [vmem:[%s3671_s16 + $0x368] sm:$0xf]  ;;  %v2936_v9 = vld [vmem:[%s3671_s16 + $0x374] sm:$0xf0]  ;;  %v2482_v13 = vor.u32 %v2904_v7, %v2481_v6  ;;  %v2882_v3 = vld [vmem:[%s3671_s16 + $0x1cc] sm:$0xf] }
  0xc8   : > { %1350 = vmatpush.bf16.msrb.mxu3 %v2558_v23  ;;  %1309 = vmatmul.bf16.vlgmr.msrb.gmra.mxu0 %v3820_v28  ;;  %v2209_v14 = vld [vmem:[%s3671_s16 + $0x48] sm:$0xf]  ;;  %v2836_v15 = vld [vmem:[%s3671_s16 + $0x54] sm:$0xf0]  ;;  %v2610_v18 = vor.u32 %v2936_v9, %v2609_v8  ;;  %v2403_v5 = vld [vmem:[%s3671_s16 + $0x1d8] sm:$0xf0] }
  0xc9   : > { %1357 = vmatpush.bf16.msra.mxu0 %v2290_v24  ;;  %1323 = vmatmul.bf16.vlgmr.msrb.gmra.mxu1 %v3827_v35  ;;  %v2337_v16 = vld [vmem:[%s3671_s16 + $0x148] sm:$0xf]  ;;  %v2868_v19 = vld [vmem:[%s3671_s16 + $0x154] sm:$0xf0]  ;;  %v2210_v24 = vor.u32 %v2836_v15, %v2209_v14  ;;  %v2914_v6 = vld [vmem:[%s3671_s16 + $0x2cc] sm:$0xf] }
  0xca   : > { %1371 = vmatpush.bf16.msra.mxu1 %v2418_v25  ;;  %1337 = vmatmul.bf16.vlgmr.msrb.gmra.mxu2 %v3802_v10  ;;  %v2465_v20 = vld [vmem:[%s3671_s16 + $0x248] sm:$0xf]  ;;  %v2900_v21 = vld [vmem:[%s3671_s16 + $0x254] sm:$0xf0]  ;;  %v2338_v25 = vor.u32 %v2868_v19, %v2337_v16  ;;  %v2531_v7 = vld [vmem:[%s3671_s16 + $0x2d8] sm:$0xf0] }
  0xcb   : > { %1385 = vmatpush.bf16.msra.mxu2 %v2546_v26  ;;  %1351 = vmatmul.bf16.vlgmr.msrb.gmra.mxu3 %v3809_v17  ;;  %v2593_v22 = vld [vmem:[%s3671_s16 + $0x348] sm:$0xf]  ;;  %v2932_v23 = vld [vmem:[%s3671_s16 + $0x354] sm:$0xf0]  ;;  %v2466_v26 = vor.u32 %v2900_v21, %v2465_v20  ;;  %v2946_v8 = vld [vmem:[%s3671_s16 + $0x3cc] sm:$0xf] }
  0xcc   : > { %1399 = vmatpush.bf16.msra.mxu3 %v2674_v31  ;;  %v2193_v27 = vld [vmem:[%s3671_s16 + $0x28] sm:$0xf]  ;;  %v2832_v29 = vld [vmem:[%s3671_s16 + $0x34] sm:$0xf0]  ;;  %v2594_v31 = vor.u32 %v2932_v23, %v2593_v22  ;;  %v2659_v9 = vld [vmem:[%s3671_s16 + $0x3d8] sm:$0xf0] }
  0xcd   : > { %1358 = vmatpush.bf16.msra.mxu0 %v2274_v38  ;;  %v2321_v30 = vld [vmem:[%s3671_s16 + $0x128] sm:$0xf]  ;;  %v2864_v32 = vld [vmem:[%s3671_s16 + $0x134] sm:$0xf0]  ;;  %v2194_v38 = vor.u32 %v2832_v29, %v2193_v27  ;;  %v2846_v14 = vld [vmem:[%s3671_s16 + $0xac] sm:$0xf] }
  0xce   : > { %1372 = vmatpush.bf16.msra.mxu1 %v2402_v39  ;;  %v2449_v33 = vld [vmem:[%s3671_s16 + $0x228] sm:$0xf]  ;;  %v2896_v34 = vld [vmem:[%s3671_s16 + $0x234] sm:$0xf0]  ;;  %v2322_v41 = vor.u32 %v2864_v32, %v2321_v30  ;;  %v2259_v15 = vld [vmem:[%s3671_s16 + $0xb8] sm:$0xf0] }
  0xcf   : > { %1386 = vmatpush.bf16.msra.mxu2 %v2530_v40  ;;  %v2577_v36 = vld [vmem:[%s3671_s16 + $0x328] sm:$0xf]  ;;  %v2928_v37 = vld [vmem:[%s3671_s16 + $0x334] sm:$0xf0]  ;;  %v2450_v42 = vor.u32 %v2896_v34, %v2449_v33  ;;  %v2878_v16 = vld [vmem:[%s3671_s16 + $0x1ac] sm:$0xf] }
  0xd0   : > { %1400 = vmatpush.bf16.msra.mxu3 %v2658_v44  ;;  %v2177_v39 = vld [vmem:[%s3671_s16 + $0x8] sm:$0xf]  ;;  %v2828_v40 = vld [vmem:[%s3671_s16 + $0x14] sm:$0xf0]  ;;  %v2578_v46 = vor.u32 %v2928_v37, %v2577_v36  ;;  %v2387_v19 = vld [vmem:[%s3671_s16 + $0x1b8] sm:$0xf0] }
  0xd1   : > { %1359 = vmatpush.bf16.msra.mxu0 %v2258_v50  ;;  %v2305_v43 = vld [vmem:[%s3671_s16 + $0x108] sm:$0xf]  ;;  %v2860_v44 = vld [vmem:[%s3671_s16 + $0x114] sm:$0xf0]  ;;  %v2854_v50 = vld [vmem:[%s3671_s16 + $0xec] sm:$0xf]  ;;  %v2178_v53 = vor.u32 %v2828_v40, %v2177_v39 }
  0xd2   : > { %1373 = vmatpush.bf16.msra.mxu1 %v2386_v51  ;;  %v2433_v45 = vld [vmem:[%s3671_s16 + $0x208] sm:$0xf]  ;;  %v2892_v47 = vld [vmem:[%s3671_s16 + $0x214] sm:$0xf0]  ;;  %v2291_v51 = vld [vmem:[%s3671_s16 + $0xf8] sm:$0xf0]  ;;  %v2306_v57 = vor.u32 %v2860_v44, %v2305_v43 }
  0xd3   : > { %1387 = vmatpush.bf16.msra.mxu2 %v2514_v52  ;;  %v2561_v48 = vld [vmem:[%s3671_s16 + $0x308] sm:$0xf]  ;;  %v2924_v49 = vld [vmem:[%s3671_s16 + $0x314] sm:$0xf0]  ;;  %v2886_v52 = vld [vmem:[%s3671_s16 + $0x1ec] sm:$0xf]  ;;  %v2434_v58 = vor.u32 %v2892_v47, %v2433_v45 }
  0xd4   : > { %1401 = vmatpush.bf16.msra.mxu3 %v2642_v56  ;;  %v2547_v56 = vld [vmem:[%s3671_s16 + $0x2f8] sm:$0xf0]  ;;  %v2562_v61 = vor.u32 %v2924_v49, %v2561_v48  ;;  %v2910_v20 = vld [vmem:[%s3671_s16 + $0x2ac] sm:$0xf] }
  0xd5   : > { %1360 = vmatpush.bf16.msra.mxu0 %v2242_v62  ;;  %v2294_v62 = vor.u32 %v2854_v50, %v2291_v51  ;;  %v2515_v21 = vld [vmem:[%s3671_s16 + $0x2b8] sm:$0xf0]  ;;  %v2942_v22 = vld [vmem:[%s3671_s16 + $0x3ac] sm:$0xf] }
  0xd6   : > { %1374 = vmatpush.bf16.msra.mxu1 %v2370_v63  ;;  %v2422_v63 = vor.u32 %v2886_v52, %v2419_v54  ;;  %v2643_v23 = vld [vmem:[%s3671_s16 + $0x3b8] sm:$0xf0]  ;;  %v2842_v27 = vld [vmem:[%s3671_s16 + $0x8c] sm:$0xf] }
  0xd7   : > { %1388 = vmatpush.bf16.msra.mxu2 %v2498_v0  ;;  %v2550_v0 = vor.u32 %v2918_v55, %v2547_v56  ;;  %v2243_v29 = vld [vmem:[%s3671_s16 + $0x98] sm:$0xf0]  ;;  %v2874_v30 = vld [vmem:[%s3671_s16 + $0x18c] sm:$0xf] }
  0xd8   : > { %1402 = vmatpush.bf16.msra.mxu3 %v2626_v4  ;;  %v2678_v4 = vor.u32 %v2950_v59, %v2675_v60  ;;  %v2371_v32 = vld [vmem:[%s3671_s16 + $0x198] sm:$0xf0]  ;;  %v2906_v33 = vld [vmem:[%s3671_s16 + $0x28c] sm:$0xf] }
  0xd9   : > { %1361 = vmatpush.bf16.msra.mxu0 %v2226_v11  ;;  %v2278_v11 = vor.u32 %v2850_v1, %v2275_v2  ;;  %v2499_v34 = vld [vmem:[%s3671_s16 + $0x298] sm:$0xf0]  ;;  %v2938_v36 = vld [vmem:[%s3671_s16 + $0x38c] sm:$0xf]  ;;  %v2374_v39 = vor.u32 %v2874_v30, %v2371_v32 }
  0xda   : > { %1375 = vmatpush.bf16.msra.mxu1 %v2354_v12  ;;  %v2406_v12 = vor.u32 %v2882_v3, %v2403_v5  ;;  %v2627_v37 = vld [vmem:[%s3671_s16 + $0x398] sm:$0xf0]  ;;  %v2502_v40 = vor.u32 %v2906_v33, %v2499_v34  ;;  %v2870_v43 = vld [vmem:[%s3671_s16 + $0x16c] sm:$0xf] }
  0xdb   : > { %1389 = vmatpush.bf16.msra.mxu2 %v2482_v13  ;;  %v2534_v13 = vor.u32 %v2914_v6, %v2531_v7  ;;  %v2630_v44 = vor.u32 %v2938_v36, %v2627_v37  ;;  %v2355_v45 = vld [vmem:[%s3671_s16 + $0x178] sm:$0xf0]  ;;  %v2934_v48 = vld [vmem:[%s3671_s16 + $0x36c] sm:$0xf]  ;;  %v449_v36 = vld [vmem:[#allocation2 + $0x30] sm:$0xff] }
  0xdc   : > { %1403 = vmatpush.bf16.msra.mxu3 %v2610_v18  ;;  %v2662_v18 = vor.u32 %v2946_v8, %v2659_v9  ;;  %v2483_v47 = vld [vmem:[%s3671_s16 + $0x278] sm:$0xf0]  ;;  %v2358_v51 = vor.u32 %v2870_v43, %v2355_v45  ;;  %v2866_v55 = vld [vmem:[%s3671_s16 + $0x14c] sm:$0xf] }
  0xdd   : > { %1362 = vmatpush.bf16.msra.mxu0 %v2210_v24  ;;  %v2262_v24 = vor.u32 %v2846_v14, %v2259_v15  ;;  %v2611_v49 = vld [vmem:[%s3671_s16 + $0x378] sm:$0xf0]  ;;  %v2930_v60 = vld [vmem:[%s3671_s16 + $0x34c] sm:$0xf] }
  0xde   : > { %1376 = vmatpush.bf16.msra.mxu1 %v2338_v25  ;;  %v2390_v25 = vor.u32 %v2878_v16, %v2387_v19  ;;  %v2211_v54 = vld [vmem:[%s3671_s16 + $0x58] sm:$0xf0]  ;;  %v2614_v56 = vor.u32 %v2934_v48, %v2611_v49  ;;  %v2830_v1 = vld [vmem:[%s3671_s16 + $0x2c] sm:$0xf] }
  0xdf   : > { %1390 = vmatpush.bf16.msra.mxu2 %v2466_v26  ;;  %v2518_v26 = vor.u32 %v2910_v20, %v2515_v21  ;;  %v2467_v59 = vld [vmem:[%s3671_s16 + $0x258] sm:$0xf0]  ;;  %v2862_v3 = vld [vmem:[%s3671_s16 + $0x12c] sm:$0xf] }
  0xe0   : > { %1404 = vmatpush.bf16.msra.mxu3 %v2594_v31  ;;  %v2646_v31 = vor.u32 %v2942_v22, %v2643_v23  ;;  %v2195_v2 = vld [vmem:[%s3671_s16 + $0x38] sm:$0xf0]  ;;  %v2894_v6 = vld [vmem:[%s3671_s16 + $0x22c] sm:$0xf] }
  0xe1   : > { %1363 = vmatpush.bf16.msra.mxu0 %v2194_v38  ;;  %v2246_v38 = vor.u32 %v2842_v27, %v2243_v29  ;;  %v2323_v5 = vld [vmem:[%s3671_s16 + $0x138] sm:$0xf0]  ;;  %v2926_v8 = vld [vmem:[%s3671_s16 + $0x32c] sm:$0xf] }
  0xe2   : > { %1377 = vmatpush.bf16.msra.mxu1 %v2322_v41  ;;  %v2838_v41 = vld [vmem:[%s3671_s16 + $0x6c] sm:$0xf]  ;;  %v2451_v7 = vld [vmem:[%s3671_s16 + $0x238] sm:$0xf0] }
  0xe3   : > { %1391 = vmatpush.bf16.msra.mxu2 %v2450_v42  ;;  %v2227_v42 = vld [vmem:[%s3671_s16 + $0x78] sm:$0xf0]  ;;  %v2826_v14 = vld [vmem:[%s3671_s16 + $0xc] sm:$0xf] }
  0xe4   : > { %1405 = vmatpush.bf16.msra.mxu3 %v2578_v46  ;;  %v2902_v46 = vld [vmem:[%s3671_s16 + $0x26c] sm:$0xf]  ;;  %v2230_v50 = vor.u32 %v2838_v41, %v2227_v42  ;;  %v2579_v9 = vld [vmem:[%s3671_s16 + $0x338] sm:$0xf0] }
  0xe5   : > { %1364 = vmatpush.bf16.msra.mxu0 %v2178_v53  ;;  %v2486_v52 = vor.u32 %v2902_v46, %v2483_v47  ;;  %v2834_v53 = vld [vmem:[%s3671_s16 + $0x4c] sm:$0xf]  ;;  %v2179_v15 = vld [vmem:[%s3671_s16 + $0x18] sm:$0xf0] }
  0xe6   : > { %1378 = vmatpush.bf16.msra.mxu1 %v2306_v57  ;;  %v2339_v57 = vld [vmem:[%s3671_s16 + $0x158] sm:$0xf0]  ;;  %v2858_v16 = vld [vmem:[%s3671_s16 + $0x10c] sm:$0xf] }
  0xe7   : > { %1392 = vmatpush.bf16.msra.mxu2 %v2434_v58  ;;  %v2898_v58 = vld [vmem:[%s3671_s16 + $0x24c] sm:$0xf]  ;;  %v2307_v19 = vld [vmem:[%s3671_s16 + $0x118] sm:$0xf0] }
  0xe8   : > { %1406 = vmatpush.bf16.msra.mxu3 %v2562_v61  ;;  %1365 = vmatmul.bf16.vlgmr.msra.gmra.mxu0 %v3820_v28  ;;  %v2595_v61 = vld [vmem:[%s3671_s16 + $0x358] sm:$0xf0]  ;;  %v2890_v20 = vld [vmem:[%s3671_s16 + $0x20c] sm:$0xf] }
  0xe9   : > { %1413 = vmatpush.bf16.msrb.mxu0 %v2294_v62  ;;  %1379 = vmatmul.bf16.vlgmr.msra.gmra.mxu1 %v3827_v35  ;;  %v2214_v62 = vor.u32 %v2834_v53, %v2211_v54  ;;  %v2435_v21 = vld [vmem:[%s3671_s16 + $0x218] sm:$0xf0]  ;;  %v2922_v22 = vld [vmem:[%s3671_s16 + $0x30c] sm:$0xf]  ;;  %v450_v54 = vld [vmem:[#allocation2] sm:$0xff] }
  0xea   : > { %1427 = vmatpush.bf16.msrb.mxu1 %v2422_v63  ;;  %1393 = vmatmul.bf16.vlgmr.msra.gmra.mxu2 %v3802_v10  ;;  %v2342_v63 = vor.u32 %v2866_v55, %v2339_v57  ;;  %v2563_v23 = vld [vmem:[%s3671_s16 + $0x318] sm:$0xf0] }
  0xeb   : > { %1441 = vmatpush.bf16.msrb.mxu2 %v2550_v0  ;;  %1407 = vmatmul.bf16.vlgmr.msra.gmra.mxu3 %v3809_v17  ;;  %v2470_v0 = vor.u32 %v2898_v58, %v2467_v59  ;;  %v2566_v27 = vor.u32 %v2922_v22, %v2563_v23  ;;  %v453_v45 = vld [vmem:[#allocation2 + $0x8] sm:$0xff] }
  0xec   : > { %1455 = vmatpush.bf16.msrb.mxu3 %v2678_v4  ;;  %v2598_v4 = vor.u32 %v2930_v60, %v2595_v61 }
  0xed   : > { %1414 = vmatpush.bf16.msrb.mxu0 %v2278_v11  ;;  %v2198_v11 = vor.u32 %v2830_v1, %v2195_v2 }
  0xee   : > { %1428 = vmatpush.bf16.msrb.mxu1 %v2406_v12  ;;  %v2326_v12 = vor.u32 %v2862_v3, %v2323_v5 }
  0xef   : > { %1442 = vmatpush.bf16.msrb.mxu2 %v2534_v13  ;;  %v2454_v13 = vor.u32 %v2894_v6, %v2451_v7 }
  0xf0   : > { %1456 = vmatpush.bf16.msrb.mxu3 %v2662_v18  ;;  %v2582_v18 = vor.u32 %v2926_v8, %v2579_v9  ;;  %v451_v8 = vld [vmem:[#allocation2 + $0x18] sm:$0xff] }
  0xf1   : > { %1415 = vmatpush.bf16.msrb.mxu0 %v2262_v24  ;;  %v2182_v24 = vor.u32 %v2826_v14, %v2179_v15 }
  0xf2   : > { %1429 = vmatpush.bf16.msrb.mxu1 %v2390_v25  ;;  %v2310_v25 = vor.u32 %v2858_v16, %v2307_v19  ;;  %v455_v19 = vld [vmem:[#allocation2 + $0x28] sm:$0xff] }
  0xf3   : > { %1443 = vmatpush.bf16.msrb.mxu2 %v2518_v26  ;;  %v2438_v26 = vor.u32 %v2890_v20, %v2435_v21 }
  0xf4   : > { %1457 = vmatpush.bf16.msrb.mxu3 %v2646_v31 }
  0xf5   : > { %1416 = vmatpush.bf16.msrb.mxu0 %v2246_v38 }
  0xf6   : > { %1430 = vmatpush.bf16.msrb.mxu1 %v2374_v39 }
  0xf7   : > { %1444 = vmatpush.bf16.msrb.mxu2 %v2502_v40 }
  0xf8   : > { %1458 = vmatpush.bf16.msrb.mxu3 %v2630_v44 }
  0xf9   : > { %1417 = vmatpush.bf16.msrb.mxu0 %v2230_v50 }
  0xfa   : > { %1431 = vmatpush.bf16.msrb.mxu1 %v2358_v51 }
  0xfb   : > { %1445 = vmatpush.bf16.msrb.mxu2 %v2486_v52 }
  0xfc   : > { %1459 = vmatpush.bf16.msrb.mxu3 %v2614_v56 }
  0xfd   : > { %1418 = vmatpush.bf16.msrb.mxu0 %v2214_v62 }
  0xfe   : > { %1432 = vmatpush.bf16.msrb.mxu1 %v2342_v63  ;;  %v454_v63 = vld [vmem:[#allocation2 + $0x20] sm:$0xff] }
  0xff   : > { %1446 = vmatpush.bf16.msrb.mxu2 %v2470_v0 }
 0x100   : > { %1460 = vmatpush.bf16.msrb.mxu3 %v2598_v4 }
 0x101   : > { %1419 = vmatpush.bf16.msrb.mxu0 %v2198_v11 }
 0x102   : > { %1433 = vmatpush.bf16.msrb.mxu1 %v2326_v12 }
 0x103   : > { %1447 = vmatpush.bf16.msrb.mxu2 %v2454_v13 }
 0x104   : > { %1461 = vmatpush.bf16.msrb.mxu3 %v2582_v18 }
 0x105   : > { %1420 = vmatpush.bf16.msrb.mxu0 %v2182_v24 }
 0x106   : > { %1434 = vmatpush.bf16.msrb.mxu1 %v2310_v25 }
 0x107   : > { %1448 = vmatpush.bf16.msrb.mxu2 %v2438_v26 }
 0x108   : > { %1462 = vmatpush.bf16.msrb.mxu3 %v2566_v27  ;;  %1421 = vmatmul.bf16.vlgmr.msrb.gmra.mxu0 %v3820_v28 }
 0x109   : > { %1435 = vmatmul.bf16.vlgmr.msrb.gmra.mxu1 %v3827_v35 }
 0x10a   : > { %1449 = vmatmul.bf16.vlgmr.msrb.gmra.mxu2 %v3802_v10 }
 0x10b   : > { %1463 = vmatmul.bf16.vlgmr.msrb.gmra.mxu3 %v3809_v17 }
 0x12b   : > { %v1254_v29 = vpop.f32.mrf.mxu0 }
 0x12d   : > { %v1268_v30 = vpop.f32.mrf.mxu1  ;;  %v1282_v32 = vpop.f32.mrf.mxu2 }
 0x12e   : > { %v1269_v31 = vadd.f32 %v1268_v30, %v1254_v29  ;;  %v452_v29 = vld [vmem:[#allocation2 + $0x10] sm:$0xff] }
 0x130   : > { %v1296_v33 = vpop.f32.mrf.mxu3  ;;  %v1283_v34 = vadd.f32 %v1282_v32, %v1269_v31 }
 0x132   : > { %v1297_v37 = vadd.f32 %v1296_v33, %v1283_v34 }
 0x133   : > { %v1256_v39 = vpop.f32.mrf.mxu0 }
 0x134   : > { %v1469_v38 = vadd.f32 %v1297_v37, %v449_v36 }
 0x135   : > { %v1270_v40 = vpop.f32.mrf.mxu1  ;;  %v1284_v42 = vpop.f32.mrf.mxu2 }
 0x136   : > { %1477 = vst [vmem:[#allocation2 + $0x30] sm:$0xff] %v1469_v38  ;;  %v1271_v41 = vadd.f32 %v1270_v40, %v1256_v39  ;;  %v456_v38 = vld [vmem:[#allocation2 + $0x38] sm:$0xff] }
 0x138   : > { %v1298_v43 = vpop.f32.mrf.mxu3  ;;  %v1285_v44 = vadd.f32 %v1284_v42, %v1271_v41 }
 0x13a   : > { %v1299_v46 = vadd.f32 %v1298_v43, %v1285_v44 }
 0x13c   : > { %v1473_v47 = vadd.f32 %v1299_v46, %v453_v45 }
 0x13e   : > { %1481 = vst [vmem:[#allocation2 + $0x8] sm:$0xff] %v1473_v47 }
 0x145   : > { %v1310_v48 = vpop.f32.mrf.mxu0 }
 0x146   : > { %v1324_v49 = vpop.f32.mrf.mxu1 }
 0x147   : > { %v1325_v50 = vadd.f32 %v1324_v49, %v1310_v48 }
 0x14d   : > { %v1338_v51 = vpop.f32.mrf.mxu2  ;;  %v1312_v56 = vpop.f32.mrf.mxu0 }
 0x14e   : > { %v1339_v52 = vadd.f32 %v1338_v51, %v1325_v50  ;;  %v1352_v53 = vpop.f32.mrf.mxu3  ;;  %v1326_v57 = vpop.f32.mrf.mxu1 }
 0x14f   : > { %v1327_v59 = vadd.f32 %v1326_v57, %v1312_v56 }
 0x150   : > { %v1353_v55 = vadd.f32 %v1352_v53, %v1339_v52 }
 0x152   : > { %v1470_v58 = vadd.f32 %v1353_v55, %v450_v54 }
 0x154   : > { %1478 = vst [vmem:[#allocation2] sm:$0xff] %v1470_v58 }
 0x155   : > { %v1340_v60 = vpop.f32.mrf.mxu2 }
 0x156   : > { %v1341_v61 = vadd.f32 %v1340_v60, %v1327_v59  ;;  %v1354_v62 = vpop.f32.mrf.mxu3 }
 0x158   : > { %v1355_v0 = vadd.f32 %v1354_v62, %v1341_v61 }
 0x15a   : > { %v1474_v1 = vadd.f32 %v1355_v0, %v454_v63 }
 0x15c   : > { %1482 = vst [vmem:[#allocation2 + $0x20] sm:$0xff] %v1474_v1 }
 0x165   : > { %v1366_v2 = vpop.f32.mrf.mxu0 }
 0x166   : > { %v1380_v3 = vpop.f32.mrf.mxu1 }
 0x167   : > { %v1381_v4 = vadd.f32 %v1380_v3, %v1366_v2 }
 0x16d   : > { %v1394_v5 = vpop.f32.mrf.mxu2  ;;  %v1368_v11 = vpop.f32.mrf.mxu0 }
 0x16e   : > { %v1395_v6 = vadd.f32 %v1394_v5, %v1381_v4  ;;  %v1408_v7 = vpop.f32.mrf.mxu3  ;;  %v1382_v12 = vpop.f32.mrf.mxu1 }
 0x16f   : > { %v1383_v14 = vadd.f32 %v1382_v12, %v1368_v11 }
 0x170   : > { %v1409_v9 = vadd.f32 %v1408_v7, %v1395_v6 }
 0x172   : > { %v1471_v13 = vadd.f32 %v1409_v9, %v451_v8 }
 0x174   : > { %1479 = vst [vmem:[#allocation2 + $0x18] sm:$0xff] %v1471_v13 }
 0x175   : > { %v1396_v15 = vpop.f32.mrf.mxu2 }
 0x176   : > { %v1397_v16 = vadd.f32 %v1396_v15, %v1383_v14  ;;  %v1410_v18 = vpop.f32.mrf.mxu3 }
 0x178   : > { %v1411_v20 = vadd.f32 %v1410_v18, %v1397_v16 }
 0x17a   : > { %v1475_v21 = vadd.f32 %v1411_v20, %v455_v19 }
 0x17c   : > { %1483 = vst [vmem:[#allocation2 + $0x28] sm:$0xff] %v1475_v21 }
 0x185   : > { %v1422_v22 = vpop.f32.mrf.mxu0 }
 0x186   : > { %v1436_v23 = vpop.f32.mrf.mxu1 }
 0x187   : > { %v1437_v24 = vadd.f32 %v1436_v23, %v1422_v22 }
 0x18d   : > { %v1450_v25 = vpop.f32.mrf.mxu2  ;;  %v1424_v31 = vpop.f32.mrf.mxu0 }
 0x18e   : > { %v1451_v26 = vadd.f32 %v1450_v25, %v1437_v24  ;;  %v1464_v27 = vpop.f32.mrf.mxu3  ;;  %v1438_v32 = vpop.f32.mrf.mxu1 }
 0x18f   : > { %v1439_v34 = vadd.f32 %v1438_v32, %v1424_v31 }
 0x190   : > { %v1465_v30 = vadd.f32 %v1464_v27, %v1451_v26 }
 0x192   : > { %v1472_v33 = vadd.f32 %v1465_v30, %v452_v29 }
 0x194   : > { %1480 = vst [vmem:[#allocation2 + $0x10] sm:$0xff] %v1472_v33 }
 0x195   : > { %v1452_v36 = vpop.f32.mrf.mxu2 }
 0x196   : > { %v1453_v37 = vadd.f32 %v1452_v36, %v1439_v34  ;;  %v1466_v39 = vpop.f32.mrf.mxu3 }
 0x198   : > { %v1467_v40 = vadd.f32 %v1466_v39, %v1453_v37  ;;  %1487 = sbr.rel (%p2679_p10) target bundleno = 594 (0x252), region = 68 }
 0x19a   : > { %v1476_v41 = vadd.f32 %v1467_v40, %v456_v38 }
 0x19c   : > { %1484 = vst [vmem:[#allocation2 + $0x38] sm:$0xff] %v1476_v41 }
 0x19d   : > { %v2960_v42 = vld [vmem:[%s3701_s17 + $0x38] sm:$0xff]  ;;  %v2959_v46 = vld [vmem:[%s3701_s17 + $0x30] sm:$0xff]  ;;  %v2958_v50 = vld [vmem:[%s3701_s17 + $0x28] sm:$0xff]  ;;  %vm1804_vm1 = vcmask 31744  }
 0x19e   : > { %v2968_v43 = vld [vmem:[%s3701_s17 + $0x78] sm:$0xff]  ;;  %1746 = vmatpush.bf16.msra.mxu0 %v2960_v42  ;;  %v2967_v47 = vld [vmem:[%s3701_s17 + $0x70] sm:$0xff]  ;;  %v2966_v51 = vld [vmem:[%s3701_s17 + $0x68] sm:$0xff] }
 0x19f   : > { %v2976_v44 = vld [vmem:[%s3701_s17 + $0xb8] sm:$0xff]  ;;  %1760 = vmatpush.bf16.msra.mxu1 %v2968_v43  ;;  %v2975_v48 = vld [vmem:[%s3701_s17 + $0xb0] sm:$0xff]  ;;  %v2974_v52 = vld [vmem:[%s3701_s17 + $0xa8] sm:$0xff] }
 0x1a0   : > { %v2984_v45 = vld [vmem:[%s3701_s17 + $0xf8] sm:$0xff]  ;;  %1774 = vmatpush.bf16.msra.mxu2 %v2976_v44  ;;  %v2983_v49 = vld [vmem:[%s3701_s17 + $0xf0] sm:$0xff]  ;;  %v2982_v53 = vld [vmem:[%s3701_s17 + $0xe8] sm:$0xff] }
 0x1a1   : > { %1788 = vmatpush.bf16.msra.mxu3 %v2984_v45  ;;  %v2957_v54 = vld [vmem:[%s3701_s17 + $0x20] sm:$0xff]  ;;  %v2956_v58 = vld [vmem:[%s3701_s17 + $0x18] sm:$0xff]  ;;  %v2955_v62 = vld [vmem:[%s3701_s17 + $0x10] sm:$0xff] }
 0x1a2   : > { %1747 = vmatpush.bf16.msra.mxu0 %v2959_v46  ;;  %v2965_v55 = vld [vmem:[%s3701_s17 + $0x60] sm:$0xff]  ;;  %v2964_v59 = vld [vmem:[%s3701_s17 + $0x58] sm:$0xff]  ;;  %v2963_v63 = vld [vmem:[%s3701_s17 + $0x50] sm:$0xff] }
 0x1a3   : > { %1761 = vmatpush.bf16.msra.mxu1 %v2967_v47  ;;  %v2973_v56 = vld [vmem:[%s3701_s17 + $0xa0] sm:$0xff]  ;;  %v2972_v60 = vld [vmem:[%s3701_s17 + $0x98] sm:$0xff]  ;;  %v2971_v0 = vld [vmem:[%s3701_s17 + $0x90] sm:$0xff] }
 0x1a4   : > { %1775 = vmatpush.bf16.msra.mxu2 %v2975_v48  ;;  %v2981_v57 = vld [vmem:[%s3701_s17 + $0xe0] sm:$0xff]  ;;  %v2980_v61 = vld [vmem:[%s3701_s17 + $0xd8] sm:$0xff]  ;;  %v2979_v1 = vld [vmem:[%s3701_s17 + $0xd0] sm:$0xff] }
 0x1a5   : > { %1789 = vmatpush.bf16.msra.mxu3 %v2983_v49  ;;  %v2954_v2 = vld [vmem:[%s3701_s17 + $0x8] sm:$0xff]  ;;  %v2953_v6 = vld [vmem:[%s3701_s17] sm:$0xff]  ;;  %v1489_v24 = vld [vmem:[#allocation3 + $0x8] sm:$0xff] }
 0x1a6   : > { %1748 = vmatpush.bf16.msra.mxu0 %v2958_v50  ;;  %v2962_v3 = vld [vmem:[%s3701_s17 + $0x48] sm:$0xff]  ;;  %v2961_v7 = vld [vmem:[%s3701_s17 + $0x40] sm:$0xff] }
 0x1a7   : > { %1762 = vmatpush.bf16.msra.mxu1 %v2966_v51  ;;  %v2970_v4 = vld [vmem:[%s3701_s17 + $0x88] sm:$0xff]  ;;  %v2969_v8 = vld [vmem:[%s3701_s17 + $0x80] sm:$0xff] }
 0x1a8   : > { %1776 = vmatpush.bf16.msra.mxu2 %v2974_v52  ;;  %v2978_v5 = vld [vmem:[%s3701_s17 + $0xc8] sm:$0xff]  ;;  %v2977_v9 = vld [vmem:[%s3701_s17 + $0xc0] sm:$0xff] }
 0x1a9   : > { %1790 = vmatpush.bf16.msra.mxu3 %v2982_v53  ;;  %v1488_v18 = vld [vmem:[#allocation3] sm:$0xff] }
 0x1aa   : > { %1749 = vmatpush.bf16.msra.mxu0 %v2957_v54 }
 0x1ab   : > { %1763 = vmatpush.bf16.msra.mxu1 %v2965_v55 }
 0x1ac   : > { %1777 = vmatpush.bf16.msra.mxu2 %v2973_v56 }
 0x1ad   : > { %1791 = vmatpush.bf16.msra.mxu3 %v2981_v57 }
 0x1ae   : > { %1750 = vmatpush.bf16.msra.mxu0 %v2956_v58 }
 0x1af   : > { %1764 = vmatpush.bf16.msra.mxu1 %v2964_v59 }
 0x1b0   : > { %1778 = vmatpush.bf16.msra.mxu2 %v2972_v60 }
 0x1b1   : > { %1792 = vmatpush.bf16.msra.mxu3 %v2980_v61 }
 0x1b2   : > { %1751 = vmatpush.bf16.msra.mxu0 %v2955_v62 }
 0x1b3   : > { %1765 = vmatpush.bf16.msra.mxu1 %v2963_v63 }
 0x1b4   : > { %1779 = vmatpush.bf16.msra.mxu2 %v2971_v0 }
 0x1b5   : > { %1793 = vmatpush.bf16.msra.mxu3 %v2979_v1 }
 0x1b6   : > { %1752 = vmatpush.bf16.msra.mxu0 %v2954_v2 }
 0x1b7   : > { %1766 = vmatpush.bf16.msra.mxu1 %v2962_v3 }
 0x1b8   : > { %1780 = vmatpush.bf16.msra.mxu2 %v2970_v4 }
 0x1b9   : > { %1794 = vmatpush.bf16.msra.mxu3 %v2978_v5 }
 0x1ba   : > { %1753 = vmatpush.bf16.msra.mxu0 %v2953_v6 }
 0x1bb   : > { %1767 = vmatpush.bf16.msra.mxu1 %v2961_v7 }
 0x1bc   : > { %1781 = vmatpush.bf16.msra.mxu2 %v2969_v8 }
 0x1bd   : > { %1795 = vmatpush.bf16.msra.mxu3 %v2977_v9  ;;  %1754 = vmatmul.bf16.vlgmr.msra.gmra.mxu0 %v3820_v28 }
 0x1be   : > { %1768 = vmatmul.bf16.vlgmr.msra.gmra.mxu1 %v3827_v35 }
 0x1bf   : > { %1782 = vmatmul.bf16.vlgmr.msra.gmra.mxu2 %v3802_v10 }
 0x1c0   : > { %1796 = vmatmul.bf16.vlgmr.msra.gmra.mxu3 %v3809_v17 }
 0x23a   : > { %v1755_v11 = vpop.f32.mrf.mxu0 }
 0x23b   : > { %v1769_v12 = vpop.f32.mrf.mxu1 }
 0x23c   : > { %v1770_v13 = vadd.f32 %v1769_v12, %v1755_v11 }
 0x242   : > { %v1783_v14 = vpop.f32.mrf.mxu2  ;;  %v1757_v20 = vpop.f32.mrf.mxu0 }
 0x243   : > { %v1797_v15 = vpop.f32.mrf.mxu3  ;;  %v1784_v16 = vadd.f32 %v1783_v14, %v1770_v13  ;;  %v1771_v21 = vpop.f32.mrf.mxu1 }
 0x244   : > { %v1772_v28 = vadd.f32 %v1771_v21, %v1757_v20 }
 0x245   : > { %v1798_v19 = vadd.f32 %v1797_v15, %v1784_v16 }
 0x247   : > { %v1802_v22 = vadd.f32 %v1798_v19, %v1488_v18 }
 0x249   : > { %1805 = vst.msk [vmem:[#allocation3] sm:$0xff] %vm1804_vm1, %v1802_v22 }
 0x24a   : > { %v1785_v23 = vpop.f32.mrf.mxu2 }
 0x24b   : > { %v1786_v35 = vadd.f32 %v1785_v23, %v1772_v28  ;;  %v1799_v10 = vpop.f32.mrf.mxu3 }
 0x24d   : > { %v1800_v25 = vadd.f32 %v1799_v10, %v1786_v35 }
 0x24f   : > { %v1803_v17 = vadd.f32 %v1800_v25, %v1489_v24 }
 0x251   : > { %1806 = vst.msk [vmem:[#allocation3 + $0x8] sm:$0xff] %vm1804_vm1, %v1803_v17 }
 0x252 PF: > { %s4165_s3 = sld [smem:[#allocation22_spill]] }
 0x258   : > { %p2808_p11 = scmp.ne.s32.totalorder %s4165_s3, 1 }
 0x25a   : > { %1810 = sbr.rel (%p2808_p11) target bundleno = 765 (0x2fd), region = 72 }
 0x25f   : > { %v1814_v26 = vld [vmem:[%s3689_s14] sm:$0xff]  ;;  %vm1825_vm2 = vcmask 1041408   ;;  %v1812_v29 = vld [vmem:[#allocation3 + $0x8] sm:$0xff]  ;;  %vm1821_vm3 = vcmask 31744   ;;  %v1898_v40 = vld [vmem:[%s3681_s7] sm:$0xf] }
 0x260   : > { %1816 = vst [vmem:[#allocation1] ss:$4 sm:$0xff] %v1814_v26  ;;  %v1811_v27 = vld [vmem:[#allocation3] sm:$0xff]  ;;  %v1900_v41 = vperm.slane %v1898_v40, 0  ;;  %v1901_v42 = vperm.slane %v1898_v40, 1  ;;  %v1890_v43 = vld [vmem:[#allocation2 + $0x30] sm:$0xff] }
 0x261   : > { %v1813_v36 = vpack.c.bf16 %v1812_v29, %v1811_v27  ;;  %v1891_v44 = vld [vmem:[#allocation2] sm:$0xff]  ;;  %v1902_v49 = vperm.slane %v1898_v40, 2  ;;  %v1892_v52 = vld [vmem:[#allocation2 + $0x18] sm:$0xff]  ;;  %v1903_v53 = vperm.slane %v1898_v40, 3  ;;  %v1893_v54 = vld [vmem:[#allocation2 + $0x10] sm:$0xff] }
 0x262   : > { %v1908_v45 = vadd.f32 %v1900_v41, %v1890_v43  ;;  %v1909_v46 = vadd.f32 %v1901_v42, %v1891_v44  ;;  %v1894_v55 = vld [vmem:[#allocation2 + $0x8] sm:$0xff]  ;;  %v1895_v56 = vld [vmem:[#allocation2 + $0x20] sm:$0xff]  ;;  %v1897_v6 = vld [vmem:[#allocation2 + $0x38] sm:$0xff] }
 0x263   : > { %v1910_v57 = vadd.f32 %v1902_v49, %v1892_v52  ;;  %v1911_v58 = vadd.f32 %v1903_v53, %v1893_v54  ;;  %v1912_v59 = vadd.f32 %v1900_v41, %v1894_v55  ;;  %v1913_v60 = vadd.f32 %v1901_v42, %v1895_v56  ;;  %v1896_v4 = vld [vmem:[#allocation2 + $0x28] sm:$0xff] }
 0x264   : > { %v1914_v7 = vadd.f32 %v1902_v49, %v1896_v4  ;;  %v1915_v8 = vadd.f32 %v1903_v53, %v1897_v6 }
 0x267   : > { %v1817_v30 = vld.sshfl [vmem:[#allocation1] sm:$0xff pattern:$0x73625140]  ;;  %v1818_v31 = vld.sshfl [vmem:[#allocation1 + $0x8] sm:$0xff pattern:$0x73625140] }
 0x268   : > { %v1826_v32 = vsel %vm1825_vm2, %v1817_v30, 0  ;;  %v1828_v33 = vsel %vm1825_vm2, %v1818_v31, 0  ;;  %v1819_v34 = vld.sshfl [vmem:[#allocation1 + $0x10] sm:$0xff pattern:$0x73625140] }
 0x269   : > { %1841 = vmatpush.bf16.msra.mxu0 %v1826_v32  ;;  %1855 = vmatpush.bf16.msra.mxu1 %v1828_v33  ;;  %v1830_v37 = vsel %vm1825_vm2, %v1819_v34, 0  ;;  %v1820_v38 = vld.sshfl [vmem:[#allocation1 + $0x18] sm:$0xff pattern:$0x73625140] }
 0x26a   : > { %1869 = vmatpush.bf16.msra.mxu2 %v1830_v37  ;;  %v1832_v39 = vsel %vm1825_vm2, %v1820_v38, 0 }
 0x26b   : > { %1883 = vmatpush.bf16.msra.mxu3 %v1832_v39 }
 0x26c   : > { %2809 = vmatmul.msk.bf16.vlgmr.msra.gmra.mxu0 %vm1821_vm3, %v1813_v36  ;;  %2810 = vmatmul.msk.bf16.vlgmr.msra.gmra.mxu1 %vm1821_vm3, %v1813_v36 }
 0x26d   : > { %2811 = vmatmul.msk.bf16.vlgmr.msra.gmra.mxu2 %vm1821_vm3, %v1813_v36 }
 0x26e   : > { %2812 = vmatmul.msk.bf16.vlgmr.msra.gmra.mxu3 %vm1821_vm3, %v1813_v36 }
 0x2e9   : > { %v1843_v47 = vpop.f32.mrf.mxu0  ;;  %v1857_v48 = vpop.f32.mrf.mxu1 }
 0x2ea   : > { %v1916_v50 = vadd.f32 %v1908_v45, %v1843_v47  ;;  %v1917_v51 = vadd.f32 %v1909_v46, %v1857_v48 }
 0x2ec   : > { %1924 = vst [vmem:[%s3703_s29] sm:$0xff] %v1916_v50 }
 0x2ed   : > { %1925 = vst [vmem:[%s3703_s29 + $0x8] sm:$0xff] %v1917_v51 }
 0x2f0   : > { %v1871_v61 = vpop.f32.mrf.mxu2 }
 0x2f1   : > { %v1918_v62 = vadd.f32 %v1910_v57, %v1871_v61  ;;  %v1885_v63 = vpop.f32.mrf.mxu3  ;;  %v1845_v0 = vpop.f32.mrf.mxu0 }
 0x2f2   : > { %v1919_v1 = vadd.f32 %v1911_v58, %v1885_v63  ;;  %v1920_v2 = vadd.f32 %v1912_v59, %v1845_v0  ;;  %v1859_v3 = vpop.f32.mrf.mxu1 }
 0x2f3   : > { %1926 = vst [vmem:[%s3703_s29 + $0x10] sm:$0xff] %v1918_v62  ;;  %v1921_v5 = vadd.f32 %v1913_v60, %v1859_v3 }
 0x2f4   : > { %1927 = vst [vmem:[%s3703_s29 + $0x18] sm:$0xff] %v1919_v1 }
 0x2f5   : > { %1928 = vst [vmem:[%s3703_s29 + $0x20] sm:$0xff] %v1920_v2 }
 0x2f6   : > { %1929 = vst [vmem:[%s3703_s29 + $0x28] sm:$0xff] %v1921_v5 }
 0x2f8   : > { %v1873_v9 = vpop.f32.mrf.mxu2 }
 0x2f9   : > { %v1922_v11 = vadd.f32 %v1914_v7, %v1873_v9  ;;  %v1887_v12 = vpop.f32.mrf.mxu3 }
 0x2fa   : > { %v1923_v13 = vadd.f32 %v1915_v8, %v1887_v12 }
 0x2fb   : > { %1930 = vst [vmem:[%s3703_s29 + $0x30] sm:$0xff] %v1922_v11 }
 0x2fc   : > { %1931 = vst [vmem:[%s3703_s29 + $0x38] sm:$0xff] %v1923_v13 }
 0x2fd PF: > { %s4166_s18 = sld [smem:[#allocation23_spill]]  ;;  %s1948_s7 = sshll.u32 %s3703_s29, 4  ;;  %s1949_s7 = int_to_ptr.vmem [resolvable:$true] %s1948_s7 }
 0x2fe   : > { %s4167_s16 = sld [smem:[#allocation35_spill]]  ;;  %s1933_s1 = scalar_lea.sflag [#allocation6], %s3678_s4 }
 0x303   : > { %s2985_s20 = sshll.u32 %s4166_s18, 5 }
 0x304   : > { %s1947_s11 = scalar_lea.hbm %s4167_s16, %s2985_s20  ;;  %s3275_s8 = scalar_lea.hbm %s4167_s16, 128 }
 0x305   : > { %s1950_s9 = sshll.u32 %s1947_s11, 4  ;;  %s1951_s9 = int_to_ptr.hbm [resolvable:$true] %s1950_s9 }
 0x306   : > { %s3269_s14 = sshra.s32 %s1951_s9, 4  ;;  %s3270_s14 = int_to_ptr.hbm [resolvable:$true] %s3269_s14 }
 0x307   : > { %s3271_s24 = scalar_lea.hbm %s3270_s14, 64  ;;  %p3276_p3 = scmp.lt.s32.totalorder %s3270_s14, %s4167_s16 }
 0x308   : > { %p3272_p13 = scmp.ne.s32.totalorder %s3270_s14, %s3271_s24  ;;  %p3277_p1 = scmp.lt.s32.totalorder %s3275_s8, %s3271_s24 }
 0x30a   : > { %p3273_p0 = pnand %p3272_p13, %p3638_p6  ;;  %p3278_p7 = por %p3277_p1, %p3276_p3 }
 0x30c   : > { %p3274_p2 = pneg %p3273_p0 }
 0x30e   : > { %p3279_p12 = pnand %p3278_p7, %p3274_p2 }
 0x310   : > { %3282 = shalt.err (!%p3279_p12)
}
 0x311   : > { %s3420_s4 = smov 512   ;;  %s3421_s5 = smov 1024  }
 0x312   : > { %s3422_s17 = smov 32  }
 0x313   : > { %2994 = dma.vmem_to_hbm [thread:$0]  (%p3638_p6), %s1949_s7, 1024, %s1951_s9, %s1933_s1, %s3420_s4, %s3421_s5, %s3422_s17  }
 0x314 PF: > { %s4168_s29 = sld [smem:[#allocation18_spill]]  ;;  %p3014_p4 = scmp.ge.s32.totalorder %s3413_s6, 2 }
 0x316   : > { %p3010_p8 = pnand %p3014_p4, %p3642_p5 }
 0x318   : > { %p3011_p9 = pneg %p3010_p8 }
 0x31a   : > { %s1965_s15 = sand.u32 1, %s4168_s29  }
 0x31b   : > { %s1966_s0 = scalar_lea.sflag [#allocation6], %s1965_s15 }
 0x31c   : > { %3356 = dma.done.wait (%p3011_p9), %s1966_s0, 1024  }
 0x31d   : > { %3358 = vsyncadd (%p3011_p9), %s1966_s0, 4294966272  ;;  %s27_s6 = sadd.s32 1, %s3413_s6   ;;  %s4171_s12 = sld [smem:[#allocation19_spill]] }
 0x31e   : > { %p4066_p10 = scmp.ge.s32.totalorder %s27_s6, 6   ;;  %s4172_s20 = sld [smem:[#allocation29_spill]] }
 0x31f   : > { %s4173_s23 = sld [smem:[#allocation20_spill]]  ;;  %s4180_s18 = smov %s3365_s19 }
 0x320   : > { %s4174_s26 = sld [smem:[#allocation27_spill]]  ;;  %s4182_s21 = smov %s3377_s22 }
 0x321   : > { %s4175_s11 = sld [smem:[#allocation21_spill]]  ;;  %s4185_s24 = smov %s3389_s25 }
 0x322   : > { %s4176_s7 = sld [smem:[#allocation28_spill]]  ;;  %s4188_s28 = smov %s3409_s30 }
 0x323   : > { %s4177_s27 = sld [smem:[#allocation24_spill]]  ;;  %s4181_s19 = smov %s4171_s12 }
 0x324   : > { %s4178_s29 = sld [smem:[#allocation25_spill]] }
 0x325   : > { %s4179_s9 = sld [smem:[#allocation26_spill]]  ;;  %s4183_s22 = smov %s4173_s23 }
 0x326   : > { %s4184_s23 = smov %s4174_s26 }
 0x327   : > { %s4186_s25 = smov %s4175_s11  ;;  %26 = sbr.rel (!%p4066_p10) target bundleno = 20 (0x14), region = 141 }
 0x328   : > { %s4187_s26 = smov %s4176_s7 }
 0x32b   : > { %s4189_s30 = smov %s4179_s9 }
 0x32c   :  { %1972 = vsyncpa [#allocation5], 1 }
 0x32d   :  { %1974 = vsyncpa [#allocation5 + $0x1], 1 }
 0x32e   :  { %1975 = vsyncpa [#allocation8], 1 }
 0x32f   :  { %1977 = vsyncpa [#allocation8 + $0x1], 1 }
 0x330   :  { %1978 = vsyncpa [#allocation11], 1 }
 0x331   :  { %1980 = vsyncpa [#allocation11 + $0x1], 1 }
 0x332   :  { %1981 = vsyncpa [#allocation6], 1 }
 0x333   :  { %1983 = vsyncpa [#allocation6 + $0x1], 1 }

</bundles_post_ra>
